<compile_context>
chip_gen: v5e
topology: v5e:2x2
jax: 0.10.0
libtpu: 0.0.40
codegen_flags: <defaults>
</compile_context>

<pallas_src>
import functools

import numpy as np
import jax
import jax.numpy as jnp
from jax import lax
from jax.experimental import pallas as pl
from jax.experimental.pallas import tpu as pltpu


# ------------------------------- helpers ------------------------------------


def _round_up(x, m):
    return ((x + m - 1) // m) * m


def _pairwise_sq_dists(e):
    """e: (n_pad, d_pad) f32 -> (n_pad, n_pad) squared euclidean distances."""
    n_pad = e.shape[0]
    # Gram matrix on the MXU (contract feature axis of both operands, no
    # explicit transpose materialized).
    g = lax.dot_general(e, e, (((1,), (1,)), ((), ())),
                        preferred_element_type=jnp.float32)          # (n, n)
    eye = (lax.broadcasted_iota(jnp.int32, (n_pad, n_pad), 0) ==
           lax.broadcasted_iota(jnp.int32, (n_pad, n_pad), 1)).astype(jnp.float32)
    sq_col = jnp.sum(g * eye, axis=1, keepdims=True)                  # (n, 1)
    sq_row = jnp.sum(g * eye, axis=0, keepdims=True)                  # (1, n)
    return sq_col + sq_row - 2.0 * g


# ----------------------------- Pallas kernel --------------------------------


def _triplet_tile_kernel(nvalid_ref, ia_ref, ip_ref, in_ref, emb_ref, *rest,
                         margin, has_peer):
    """Grid = (num_splits [parallel], tiles_per_split [arbitrary])."""
    if has_peer:
        (peer_ref, loss_ref, kdap_ref, kdan_ref,
         dist_sc, pdist_sc, acc_l, acc_ap, acc_an) = rest
    else:
        peer_ref = pdist_sc = kdap_ref = kdan_ref = acc_ap = acc_an = None
        (loss_ref, dist_sc, acc_l) = rest

    s = pl.program_id(0)
    j = pl.program_id(1)
    n_j = pl.num_programs(1)
    t_tile = ia_ref.shape[0]
    n_pad = dist_sc.shape[0]

    # ---- once per split: build distance matrices, zero accumulators --------
    @pl.when(j == 0)
    def _():
        dist_sc[...] = _pairwise_sq_dists(emb_ref[...])
        acc_l[...] = jnp.zeros_like(acc_l)
        if has_peer:
            pdist_sc[...] = _pairwise_sq_dists(peer_ref[...])
            acc_ap[...] = jnp.zeros_like(acc_ap)
            acc_an[...] = jnp.zeros_like(acc_an)

    # ---- per tile: one-hot gather of the per-triplet distances (MXU) -------
    iota_n = lax.broadcasted_iota(jnp.int32, (t_tile, n_pad), 1)
    oa = (ia_ref[...] == iota_n).astype(jnp.float32)   # (t_tile, n_pad)
    op = (ip_ref[...] == iota_n).astype(jnp.float32)
    on = (in_ref[...] == iota_n).astype(jnp.float32)

    row_d = jnp.dot(oa, dist_sc[...], preferred_element_type=jnp.float32)
    d_ap = jnp.sum(row_d * op, axis=1, keepdims=True)  # (t_tile, 1)
    d_an = jnp.sum(row_d * on, axis=1, keepdims=True)

    # mask padded triplets (true count comes from SMEM scalar prefetch)
    base = (s * n_j + j) * t_tile
    local = lax.broadcasted_iota(jnp.int32, (t_tile, 1), 0)
    valid = ((base + local) < nvalid_ref[0]).astype(jnp.float32)

    acc_l[...] += jnp.maximum(d_ap - d_an + margin, 0.0) * valid

    if has_peer:
        prow_d = jnp.dot(oa, pdist_sc[...], preferred_element_type=jnp.float32)
        pd_ap = jnp.sum(prow_d * op, axis=1, keepdims=True)
        pd_an = jnp.sum(prow_d * on, axis=1, keepdims=True)
        acc_ap[...] += jnp.maximum(d_ap - pd_ap, 0.0) * valid
        acc_an[...] += jnp.maximum(pd_an - d_an, 0.0) * valid

    # ---- once per split: reduce accumulator, scale by 1/T, emit partial ----
    @pl.when(j == n_j - 1)
    def _():
        inv = 1.0 / nvalid_ref[0].astype(jnp.float32)
        tot_l = jnp.sum(acc_l[...], axis=0, keepdims=True) * inv      # (1, 1)
        loss_ref[...] = jnp.broadcast_to(tot_l, loss_ref.shape)
        if has_peer:
            tot_ap = jnp.sum(acc_ap[...], axis=0, keepdims=True) * inv
            tot_an = jnp.sum(acc_an[...], axis=0, keepdims=True) * inv
            kdap_ref[...] = jnp.broadcast_to(tot_ap, kdap_ref.shape)
            kdan_ref[...] = jnp.broadcast_to(tot_an, kdan_ref.shape)


# --------------------------- host-side triplet mining -----------------------


def all_triplets_selector(target):
    """Vectorized 'AllTripletSelector': all (a, p, n) with label[a]==label[p],
    a != p, label[n] != label[a].  Stays on host (data-dependent length)."""
    # TODO(synk): triplet mining is data-dependent / variable-length; no clean
    # Pallas equivalent, so it remains host-side numpy.
    target = np.asarray(target)
    n = target.shape[0]
    same = target[:, None] == target[None, :]
    eye = np.eye(n, dtype=bool)
    anchors, positives = np.nonzero(same & ~eye)
    if anchors.size == 0:
        return np.zeros((0, 3), dtype=np.int32)
    pair_idx, negatives = np.nonzero(~same[anchors])
    trips = np.stack(
        [anchors[pair_idx], positives[pair_idx], negatives], axis=1)
    return trips.astype(np.int32)


# ------------------------------ Python wrapper -------------------------------


def online_triplet_loss(embeddings, target, rd, *, margin,
                        peer_embeddings=None, t_tile=1024, num_splits=2):
    """Mirrors OnlineTripletLoss.forward; returns (loss_scalar, num_triplets)."""
    embeddings = jnp.asarray(embeddings, jnp.float32)
    triplets = all_triplets_selector(target)
    t = int(triplets.shape[0])
    if t == 0:
        # Guard: no valid triplets -> define loss as 0 (avoids 0/0).
        return jnp.float32(0.0), 0

    n, d = embeddings.shape
    n_pad = _round_up(n, 128)          # lanes of the distance matrix
    d_pad = _round_up(d, 128)          # matmul K dim
    t_tile = _round_up(int(t_tile), 8)
    t_padded = _round_up(t, t_tile * num_splits)   # bucketed -> fewer recompiles
    tiles_per_split = t_padded // (t_tile * num_splits)

    emb = jnp.pad(embeddings, ((0, n_pad - n), (0, d_pad - d)))

    idx = np.zeros((t_padded, 3), np.int32)        # pad rows point at row 0,
    idx[:t] = triplets                             # masked out in-kernel
    ia = jnp.asarray(idx[:, 0:1])
    ip = jnp.asarray(idx[:, 1:2])
    ineg = jnp.asarray(idx[:, 2:3])
    nvalid = jnp.array([t], dtype=jnp.int32)

    def idx_spec():
        return pl.BlockSpec((t_tile, 1),
                            lambda s, j, nv: (s * tiles_per_split + j, 0))

    emb_spec = pl.BlockSpec((n_pad, d_pad), lambda s, j, nv: (0, 0))
    out_spec = pl.BlockSpec((8, 128), lambda s, j, nv: (s, 0))
    out_sds = jax.ShapeDtypeStruct((num_splits * 8, 128), jnp.float32)

    cparams = pltpu.CompilerParams(
        dimension_semantics=("parallel", "arbitrary"),
        vmem_limit_bytes=64 * 1024 * 1024)

    if peer_embeddings is None:
        kernel = functools.partial(
            _triplet_tile_kernel, margin=float(margin), has_peer=False)
        out = pl.pallas_call(
            kernel,
            out_shape=out_sds,
            grid_spec=pltpu.PrefetchScalarGridSpec(
                num_scalar_prefetch=1,
                grid=(num_splits, tiles_per_split),
                in_specs=[idx_spec(), idx_spec(), idx_spec(), emb_spec],
                out_specs=out_spec,
                scratch_shapes=[
                    pltpu.VMEM((n_pad, n_pad), jnp.float32),   # dist matrix
                    pltpu.VMEM((t_tile, 1), jnp.float32),      # loss accum
                ]),
            compiler_params=cparams,
        )(nvalid, ia, ip, ineg, emb)
        loss = jnp.sum(out[::8, 0])   # sum per-split partial means
        return loss, t

    peer = jnp.pad(jnp.asarray(peer_embeddings, jnp.float32),
                   ((0, n_pad - n), (0, d_pad - d)))

    kernel = functools.partial(
        _triplet_tile_kernel, margin=float(margin), has_peer=True)
    out_loss, out_ap, out_an = pl.pallas_call(
        kernel,
        out_shape=(out_sds, out_sds, out_sds),
        grid_spec=pltpu.PrefetchScalarGridSpec(
            num_scalar_prefetch=1,
            grid=(num_splits, tiles_per_split),
            in_specs=[idx_spec(), idx_spec(), idx_spec(), emb_spec, emb_spec],
            out_specs=(out_spec, out_spec, out_spec),
            scratch_shapes=[
                pltpu.VMEM((n_pad, n_pad), jnp.float32),   # dist matrix
                pltpu.VMEM((n_pad, n_pad), jnp.float32),   # peer dist matrix
                pltpu.VMEM((t_tile, 1), jnp.float32),      # loss accum
                pltpu.VMEM((t_tile, 1), jnp.float32),      # kd_ap accum
                pltpu.VMEM((t_tile, 1), jnp.float32),      # kd_an accum
            ]),
        compiler_params=cparams,
    )(nvalid, ia, ip, ineg, emb, peer)

    loss = jnp.sum(out_loss[::8, 0])
    kd_ap = jnp.sum(out_ap[::8, 0])
    kd_an = jnp.sum(out_an[::8, 0])
    total = loss + rd * kd_ap + rd * kd_an
    return total, t


# ------------------------------- pure-JAX ref --------------------------------


def _reference(embeddings, triplets, margin, rd, peer_embeddings=None):
    a = embeddings[triplets[:, 0]]
    p = embeddings[triplets[:, 1]]
    n = embeddings[triplets[:, 2]]
    ap = jnp.sum((a - p) ** 2, axis=1)
    an = jnp.sum((a - n) ** 2, axis=1)
    losses = jnp.maximum(ap - an + margin, 0.0)
    if peer_embeddings is None:
        return jnp.mean(losses)
    pa = peer_embeddings[triplets[:, 0]]
    pp = peer_embeddings[triplets[:, 1]]
    pn = peer_embeddings[triplets[:, 2]]
    pap = jnp.sum((pa - pp) ** 2, axis=1)
    pan = jnp.sum((pa - pn) ** 2, axis=1)
    kd_ap = jnp.maximum(-pap + ap, 0.0)
    kd_an = jnp.maximum(-an + pan, 0.0)
    return jnp.mean(losses) + rd * jnp.mean(kd_ap) + rd * jnp.mean(kd_an)


# ---------------------------------- main -------------------------------------


if __name__ == "__main__":
    key = jax.random.PRNGKey(0)
    k1, k2 = jax.random.split(key)

    N, D = 8, 32
    margin = 1.0
    rd = 0.5

    embeddings = jax.random.normal(k1, (N, D), dtype=jnp.float32)
    peer_embeddings = jax.random.normal(k2, (N, D), dtype=jnp.float32)
    target = np.array([0, 0, 1, 1, 2, 2, 0, 1], dtype=np.int32)

    # Peer branch (small tile -> exercises multi-step accumulation + masking).
    loss_peer, n_trip = online_triplet_loss(
        embeddings, target, rd, margin=margin,
        peer_embeddings=peer_embeddings, t_tile=32, num_splits=2)
    loss_peer = jax.block_until_ready(loss_peer)

    # No-peer branch (default production tile -> exercises heavy padding path).
    loss_plain, _ = online_triplet_loss(embeddings, target, rd, margin=margin)
    loss_plain = jax.block_until_ready(loss_plain)

    # Verify against a pure-JAX reference.
    trips = all_triplets_selector(target)
    ref_peer = _reference(embeddings, trips, margin, rd, peer_embeddings)
    ref_plain = _reference(embeddings, trips, margin, rd)
    np.testing.assert_allclose(np.asarray(loss_peer), np.asarray(ref_peer),
                               rtol=1e-4, atol=1e-4)
    np.testing.assert_allclose(np.asarray(loss_plain), np.asarray(ref_plain),
                               rtol=1e-4, atol=1e-4)
    assert n_trip == trips.shape[0]

    print("KERNEL_OK")
</pallas_src>

<mosaic_0001>
module attributes {stable_mosaic.version = 11 : i64} {
  func.func @_triplet_tile_kernel(%arg0: i32, %arg1: i32, %arg2: memref<1xi32, #tpu.memory_space<smem>>, %arg3: memref<32x1xi32, #tpu.memory_space<vmem>>, %arg4: memref<32x1xi32, #tpu.memory_space<vmem>>, %arg5: memref<32x1xi32, #tpu.memory_space<vmem>>, %arg6: memref<128x128xf32, #tpu.memory_space<vmem>>, %arg7: memref<128x128xf32, #tpu.memory_space<vmem>>, %arg8: memref<8x128xf32, #tpu.memory_space<vmem>>, %arg9: memref<8x128xf32, #tpu.memory_space<vmem>>, %arg10: memref<8x128xf32, #tpu.memory_space<vmem>>, %arg11: memref<128x128xf32, #tpu.memory_space<vmem>>, %arg12: memref<128x128xf32, #tpu.memory_space<vmem>>, %arg13: memref<32x1xf32, #tpu.memory_space<vmem>>, %arg14: memref<32x1xf32, #tpu.memory_space<vmem>>, %arg15: memref<32x1xf32, #tpu.memory_space<vmem>>) attributes {dimension_semantics = [#tpu.dimension_semantics<parallel>, #tpu.dimension_semantics<arbitrary>], iteration_bounds = array<i64: 2, 2>, scalar_prefetch = 1 : i64, scratch_operands = 5 : i64, tpu.core_type = #tpu.core_type<tc>, window_params = [{transform_indices = @transform_0, window_bounds = array<i64: 32, 1>}, {transform_indices = @transform_1, window_bounds = array<i64: 32, 1>}, {transform_indices = @transform_2, window_bounds = array<i64: 32, 1>}, {pipeline_mode = #tpu.pipeline_mode<synchronous>, transform_indices = @transform_3, window_bounds = array<i64: 128, 128>}, {pipeline_mode = #tpu.pipeline_mode<synchronous>, transform_indices = @transform_4, window_bounds = array<i64: 128, 128>}, {transform_indices = @transform_5, window_bounds = array<i64: 8, 128>}, {transform_indices = @transform_6, window_bounds = array<i64: 8, 128>}, {transform_indices = @transform_7, window_bounds = array<i64: 8, 128>}]} {
    %c0_i32 = arith.constant 0 : i32
    %0 = arith.cmpi eq, %arg1, %c0_i32 : i32
    %1 = arith.extui %0 : i1 to i32
    %c0_i32_0 = arith.constant 0 : i32
    %2 = arith.cmpi ne, %1, %c0_i32_0 : i32
    scf.if %2 {
      %c0_33 = arith.constant 0 : index
      %c0_34 = arith.constant 0 : index
      %72 = vector.load %arg6[%c0_33, %c0_34] : memref<128x128xf32, #tpu.memory_space<vmem>>, vector<128x128xf32>
      %cst_35 = arith.constant dense<0.000000e+00> : vector<128x128xf32>
      %73 = tpu.matmul %72, %72, %cst_35 {dimension_numbers = #tpu.dot_dimension_numbers<[1], [1], [0], [0], [0, 0, 1, 0], [], []>} : vector<128x128xf32>, vector<128x128xf32>, vector<128x128xf32> -> vector<128x128xf32>
      %74 = tpu.iota {dimensions = array<i32: 0>} : vector<128x128xi32>
      %75 = tpu.iota {dimensions = array<i32: 1>} : vector<128x128xi32>
      %76 = arith.cmpi eq, %74, %75 : vector<128x128xi32>
      %77 = arith.extui %76 : vector<128x128xi1> to vector<128x128xi32>
      %78 = arith.sitofp %77 : vector<128x128xi32> to vector<128x128xf32>
      %79 = arith.mulf %73, %78 : vector<128x128xf32>
      %cst_36 = arith.constant dense<0.000000e+00> : vector<128xf32>
      %80 = vector.multi_reduction <add>, %79, %cst_36 [1] : vector<128x128xf32> to vector<128xf32>
      %81 = vector.shape_cast %80 : vector<128xf32> to vector<128x1xf32>
      %82 = arith.mulf %73, %78 : vector<128x128xf32>
      %cst_37 = arith.constant dense<0.000000e+00> : vector<128xf32>
      %83 = vector.multi_reduction <add>, %82, %cst_37 [0] : vector<128x128xf32> to vector<128xf32>
      %84 = vector.shape_cast %83 : vector<128xf32> to vector<1x128xf32>
      %85 = vector.broadcast %81 : vector<128x1xf32> to vector<128x128xf32>
      %86 = vector.broadcast %84 : vector<1x128xf32> to vector<128x128xf32>
      %87 = arith.addf %85, %86 : vector<128x128xf32>
      %cst_38 = arith.constant 2.000000e+00 : f32
      %88 = vector.broadcast %cst_38 : f32 to vector<128x128xf32>
      %89 = arith.mulf %88, %73 : vector<128x128xf32>
      %90 = arith.subf %87, %89 : vector<128x128xf32>
      %c0_39 = arith.constant 0 : index
      %c0_40 = arith.constant 0 : index
      %91 = vector.load %arg11[%c0_39, %c0_40] : memref<128x128xf32, #tpu.memory_space<vmem>>, vector<128x128xf32>
      tpu.vector_store %arg11[%c0_39, %c0_40], %90 {strides = array<i32>} : memref<128x128xf32, #tpu.memory_space<vmem>>, vector<128x128xf32>,
      %cst_41 = arith.constant 0.000000e+00 : f32
      %92 = vector.broadcast %cst_41 : f32 to vector<32x1xf32>
      %c0_42 = arith.constant 0 : index
      %c0_43 = arith.constant 0 : index
      %93 = vector.load %arg13[%c0_42, %c0_43] : memref<32x1xf32, #tpu.memory_space<vmem>>, vector<32x1xf32>
      tpu.vector_store %arg13[%c0_42, %c0_43], %92 {strides = array<i32>} : memref<32x1xf32, #tpu.memory_space<vmem>>, vector<32x1xf32>,
      %c0_44 = arith.constant 0 : index
      %c0_45 = arith.constant 0 : index
      %94 = vector.load %arg7[%c0_44, %c0_45] : memref<128x128xf32, #tpu.memory_space<vmem>>, vector<128x128xf32>
      %cst_46 = arith.constant dense<0.000000e+00> : vector<128x128xf32>
      %95 = tpu.matmul %94, %94, %cst_46 {dimension_numbers = #tpu.dot_dimension_numbers<[1], [1], [0], [0], [0, 0, 1, 0], [], []>} : vector<128x128xf32>, vector<128x128xf32>, vector<128x128xf32> -> vector<128x128xf32>
      %96 = tpu.iota {dimensions = array<i32: 0>} : vector<128x128xi32>
      %97 = tpu.iota {dimensions = array<i32: 1>} : vector<128x128xi32>
      %98 = arith.cmpi eq, %96, %97 : vector<128x128xi32>
      %99 = arith.extui %98 : vector<128x128xi1> to vector<128x128xi32>
      %100 = arith.sitofp %99 : vector<128x128xi32> to vector<128x128xf32>
      %101 = arith.mulf %95, %100 : vector<128x128xf32>
      %cst_47 = arith.constant dense<0.000000e+00> : vector<128xf32>
      %102 = vector.multi_reduction <add>, %101, %cst_47 [1] : vector<128x128xf32> to vector<128xf32>
      %103 = vector.shape_cast %102 : vector<128xf32> to vector<128x1xf32>
      %104 = arith.mulf %95, %100 : vector<128x128xf32>
      %cst_48 = arith.constant dense<0.000000e+00> : vector<128xf32>
      %105 = vector.multi_reduction <add>, %104, %cst_48 [0] : vector<128x128xf32> to vector<128xf32>
      %106 = vector.shape_cast %105 : vector<128xf32> to vector<1x128xf32>
      %107 = vector.broadcast %103 : vector<128x1xf32> to vector<128x128xf32>
      %108 = vector.broadcast %106 : vector<1x128xf32> to vector<128x128xf32>
      %109 = arith.addf %107, %108 : vector<128x128xf32>
      %cst_49 = arith.constant 2.000000e+00 : f32
      %110 = vector.broadcast %cst_49 : f32 to vector<128x128xf32>
      %111 = arith.mulf %110, %95 : vector<128x128xf32>
      %112 = arith.subf %109, %111 : vector<128x128xf32>
      %c0_50 = arith.constant 0 : index
      %c0_51 = arith.constant 0 : index
      %113 = vector.load %arg12[%c0_50, %c0_51] : memref<128x128xf32, #tpu.memory_space<vmem>>, vector<128x128xf32>
      tpu.vector_store %arg12[%c0_50, %c0_51], %112 {strides = array<i32>} : memref<128x128xf32, #tpu.memory_space<vmem>>, vector<128x128xf32>,
      %cst_52 = arith.constant 0.000000e+00 : f32
      %114 = vector.broadcast %cst_52 : f32 to vector<32x1xf32>
      %c0_53 = arith.constant 0 : index
      %c0_54 = arith.constant 0 : index
      %115 = vector.load %arg14[%c0_53, %c0_54] : memref<32x1xf32, #tpu.memory_space<vmem>>, vector<32x1xf32>
      tpu.vector_store %arg14[%c0_53, %c0_54], %114 {strides = array<i32>} : memref<32x1xf32, #tpu.memory_space<vmem>>, vector<32x1xf32>,
      %cst_55 = arith.constant 0.000000e+00 : f32
      %116 = vector.broadcast %cst_55 : f32 to vector<32x1xf32>
      %c0_56 = arith.constant 0 : index
      %c0_57 = arith.constant 0 : index
      %117 = vector.load %arg15[%c0_56, %c0_57] : memref<32x1xf32, #tpu.memory_space<vmem>>, vector<32x1xf32>
      tpu.vector_store %arg15[%c0_56, %c0_57], %116 {strides = array<i32>} : memref<32x1xf32, #tpu.memory_space<vmem>>, vector<32x1xf32>,
    } else {
    }
    %3 = tpu.iota {dimensions = array<i32: 1>} : vector<32x128xi32>
    %c0 = arith.constant 0 : index
    %c0_1 = arith.constant 0 : index
    %4 = vector.load %arg3[%c0, %c0_1] : memref<32x1xi32, #tpu.memory_space<vmem>>, vector<32x1xi32>
    %5 = vector.broadcast %4 : vector<32x1xi32> to vector<32x128xi32>
    %6 = arith.cmpi eq, %5, %3 : vector<32x128xi32>
    %7 = arith.extui %6 : vector<32x128xi1> to vector<32x128xi32>
    %8 = arith.sitofp %7 : vector<32x128xi32> to vector<32x128xf32>
    %c0_2 = arith.constant 0 : index
    %c0_3 = arith.constant 0 : index
    %9 = vector.load %arg4[%c0_2, %c0_3] : memref<32x1xi32, #tpu.memory_space<vmem>>, vector<32x1xi32>
    %10 = vector.broadcast %9 : vector<32x1xi32> to vector<32x128xi32>
    %11 = arith.cmpi eq, %10, %3 : vector<32x128xi32>
    %12 = arith.extui %11 : vector<32x128xi1> to vector<32x128xi32>
    %13 = arith.sitofp %12 : vector<32x128xi32> to vector<32x128xf32>
    %c0_4 = arith.constant 0 : index
    %c0_5 = arith.constant 0 : index
    %14 = vector.load %arg5[%c0_4, %c0_5] : memref<32x1xi32, #tpu.memory_space<vmem>>, vector<32x1xi32>
    %15 = vector.broadcast %14 : vector<32x1xi32> to vector<32x128xi32>
    %16 = arith.cmpi eq, %15, %3 : vector<32x128xi32>
    %17 = arith.extui %16 : vector<32x128xi1> to vector<32x128xi32>
    %18 = arith.sitofp %17 : vector<32x128xi32> to vector<32x128xf32>
    %c0_6 = arith.constant 0 : index
    %c0_7 = arith.constant 0 : index
    %19 = vector.load %arg11[%c0_6, %c0_7] : memref<128x128xf32, #tpu.memory_space<vmem>>, vector<128x128xf32>
    %cst = arith.constant dense<0.000000e+00> : vector<32x128xf32>
    %20 = tpu.matmul %8, %19, %cst {dimension_numbers = #tpu.dot_dimension_numbers<[1], [0], [0], [1], [0, 0, 1, 1], [], []>} : vector<32x128xf32>, vector<128x128xf32>, vector<32x128xf32> -> vector<32x128xf32>
    %21 = arith.mulf %20, %13 : vector<32x128xf32>
    %cst_8 = arith.constant dense<0.000000e+00> : vector<32xf32>
    %22 = vector.multi_reduction <add>, %21, %cst_8 [1] : vector<32x128xf32> to vector<32xf32>
    %23 = vector.shape_cast %22 : vector<32xf32> to vector<32x1xf32>
    %24 = arith.mulf %20, %18 : vector<32x128xf32>
    %cst_9 = arith.constant dense<0.000000e+00> : vector<32xf32>
    %25 = vector.multi_reduction <add>, %24, %cst_9 [1] : vector<32x128xf32> to vector<32xf32>
    %26 = vector.shape_cast %25 : vector<32xf32> to vector<32x1xf32>
    %c2_i32 = arith.constant 2 : i32
    %27 = arith.muli %arg0, %c2_i32 : i32
    %28 = arith.addi %27, %arg1 : i32
    %c32_i32 = arith.constant 32 : i32
    %29 = arith.muli %28, %c32_i32 : i32
    %30 = tpu.iota {dimensions = array<i32: 0>} : vector<32x1xi32>
    %31 = vector.broadcast %29 : i32 to vector<32x1xi32>
    %32 = arith.addi %31, %30 : vector<32x1xi32>
    %c0_10 = arith.constant 0 : index
    %33 = memref.load %arg2[%c0_10] : memref<1xi32, #tpu.memory_space<smem>>
    %34 = vector.broadcast %33 : i32 to vector<32x1xi32>
    %35 = arith.cmpi slt, %32, %34 : vector<32x1xi32>
    %36 = arith.extui %35 : vector<32x1xi1> to vector<32x1xi32>
    %37 = arith.sitofp %36 : vector<32x1xi32> to vector<32x1xf32>
    %c0_11 = arith.constant 0 : index
    %c0_12 = arith.constant 0 : index
    %38 = vector.load %arg13[%c0_11, %c0_12] : memref<32x1xf32, #tpu.memory_space<vmem>>, vector<32x1xf32>
    %39 = arith.subf %23, %26 : vector<32x1xf32>
    %cst_13 = arith.constant 1.000000e+00 : f32
    %40 = vector.broadcast %cst_13 : f32 to vector<32x1xf32>
    %41 = arith.addf %39, %40 : vector<32x1xf32>
    %cst_14 = arith.constant 0.000000e+00 : f32
    %42 = vector.broadcast %cst_14 : f32 to vector<32x1xf32>
    %43 = arith.maximumf %41, %42 : vector<32x1xf32>
    %44 = arith.mulf %43, %37 : vector<32x1xf32>
    %45 = arith.addf %38, %44 : vector<32x1xf32>
    %c0_15 = arith.constant 0 : index
    %c0_16 = arith.constant 0 : index
    %46 = vector.load %arg13[%c0_15, %c0_16] : memref<32x1xf32, #tpu.memory_space<vmem>>, vector<32x1xf32>
    tpu.vector_store %arg13[%c0_15, %c0_16], %45 {strides = array<i32>} : memref<32x1xf32, #tpu.memory_space<vmem>>, vector<32x1xf32>,
    %c0_17 = arith.constant 0 : index
    %c0_18 = arith.constant 0 : index
    %47 = vector.load %arg12[%c0_17, %c0_18] : memref<128x128xf32, #tpu.memory_space<vmem>>, vector<128x128xf32>
    %cst_19 = arith.constant dense<0.000000e+00> : vector<32x128xf32>
    %48 = tpu.matmul %8, %47, %cst_19 {dimension_numbers = #tpu.dot_dimension_numbers<[1], [0], [0], [1], [0, 0, 1, 1], [], []>} : vector<32x128xf32>, vector<128x128xf32>, vector<32x128xf32> -> vector<32x128xf32>
    %49 = arith.mulf %48, %13 : vector<32x128xf32>
    %cst_20 = arith.constant dense<0.000000e+00> : vector<32xf32>
    %50 = vector.multi_reduction <add>, %49, %cst_20 [1] : vector<32x128xf32> to vector<32xf32>
    %51 = vector.shape_cast %50 : vector<32xf32> to vector<32x1xf32>
    %52 = arith.mulf %48, %18 : vector<32x128xf32>
    %cst_21 = arith.constant dense<0.000000e+00> : vector<32xf32>
    %53 = vector.multi_reduction <add>, %52, %cst_21 [1] : vector<32x128xf32> to vector<32xf32>
    %54 = vector.shape_cast %53 : vector<32xf32> to vector<32x1xf32>
    %c0_22 = arith.constant 0 : index
    %c0_23 = arith.constant 0 : index
    %55 = vector.load %arg14[%c0_22, %c0_23] : memref<32x1xf32, #tpu.memory_space<vmem>>, vector<32x1xf32>
    %56 = arith.subf %23, %51 : vector<32x1xf32>
    %cst_24 = arith.constant 0.000000e+00 : f32
    %57 = vector.broadcast %cst_24 : f32 to vector<32x1xf32>
    %58 = arith.maximumf %56, %57 : vector<32x1xf32>
    %59 = arith.mulf %58, %37 : vector<32x1xf32>
    %60 = arith.addf %55, %59 : vector<32x1xf32>
    %c0_25 = arith.constant 0 : index
    %c0_26 = arith.constant 0 : index
    %61 = vector.load %arg14[%c0_25, %c0_26] : memref<32x1xf32, #tpu.memory_space<vmem>>, vector<32x1xf32>
    tpu.vector_store %arg14[%c0_25, %c0_26], %60 {strides = array<i32>} : memref<32x1xf32, #tpu.memory_space<vmem>>, vector<32x1xf32>,
    %c0_27 = arith.constant 0 : index
    %c0_28 = arith.constant 0 : index
    %62 = vector.load %arg15[%c0_27, %c0_28] : memref<32x1xf32, #tpu.memory_space<vmem>>, vector<32x1xf32>
    %63 = arith.subf %54, %26 : vector<32x1xf32>
    %cst_29 = arith.constant 0.000000e+00 : f32
    %64 = vector.broadcast %cst_29 : f32 to vector<32x1xf32>
    %65 = arith.maximumf %63, %64 : vector<32x1xf32>
    %66 = arith.mulf %65, %37 : vector<32x1xf32>
    %67 = arith.addf %62, %66 : vector<32x1xf32>
    %c0_30 = arith.constant 0 : index
    %c0_31 = arith.constant 0 : index
    %68 = vector.load %arg15[%c0_30, %c0_31] : memref<32x1xf32, #tpu.memory_space<vmem>>, vector<32x1xf32>
    tpu.vector_store %arg15[%c0_30, %c0_31], %67 {strides = array<i32>} : memref<32x1xf32, #tpu.memory_space<vmem>>, vector<32x1xf32>,
    %c1_i32 = arith.constant 1 : i32
    %69 = arith.cmpi eq, %arg1, %c1_i32 : i32
    %70 = arith.extui %69 : i1 to i32
    %c0_i32_32 = arith.constant 0 : i32
    %71 = arith.cmpi ne, %70, %c0_i32_32 : i32
    scf.if %71 {
      %c0_33 = arith.constant 0 : index
      %72 = memref.load %arg2[%c0_33] : memref<1xi32, #tpu.memory_space<smem>>
      %73 = arith.sitofp %72 : i32 to f32
      %cst_34 = arith.constant 1.000000e+00 : f32
      %74 = arith.divf %cst_34, %73 : f32
      %c0_35 = arith.constant 0 : index
      %c0_36 = arith.constant 0 : index
      %75 = vector.load %arg13[%c0_35, %c0_36] : memref<32x1xf32, #tpu.memory_space<vmem>>, vector<32x1xf32>
      %cst_37 = arith.constant dense<0.000000e+00> : vector<1xf32>
      %76 = vector.multi_reduction <add>, %75, %cst_37 [0] : vector<32x1xf32> to vector<1xf32>
      %77 = vector.shape_cast %76 : vector<1xf32> to vector<1x1xf32>
      %78 = vector.broadcast %74 : f32 to vector<1x1xf32>
      %79 = arith.mulf %77, %78 : vector<1x1xf32>
      %80 = vector.shape_cast %79 : vector<1x1xf32> to vector<1x1xf32>
      %81 = vector.broadcast %80 : vector<1x1xf32> to vector<8x128xf32>
      %c0_38 = arith.constant 0 : index
      %c0_39 = arith.constant 0 : index
      %82 = vector.load %arg8[%c0_38, %c0_39] : memref<8x128xf32, #tpu.memory_space<vmem>>, vector<8x128xf32>
      tpu.vector_store %arg8[%c0_38, %c0_39], %81 {strides = array<i32>} : memref<8x128xf32, #tpu.memory_space<vmem>>, vector<8x128xf32>,
      %c0_40 = arith.constant 0 : index
      %c0_41 = arith.constant 0 : index
      %83 = vector.load %arg14[%c0_40, %c0_41] : memref<32x1xf32, #tpu.memory_space<vmem>>, vector<32x1xf32>
      %cst_42 = arith.constant dense<0.000000e+00> : vector<1xf32>
      %84 = vector.multi_reduction <add>, %83, %cst_42 [0] : vector<32x1xf32> to vector<1xf32>
      %85 = vector.shape_cast %84 : vector<1xf32> to vector<1x1xf32>
      %86 = vector.broadcast %74 : f32 to vector<1x1xf32>
      %87 = arith.mulf %85, %86 : vector<1x1xf32>
      %c0_43 = arith.constant 0 : index
      %c0_44 = arith.constant 0 : index
      %88 = vector.load %arg15[%c0_43, %c0_44] : memref<32x1xf32, #tpu.memory_space<vmem>>, vector<32x1xf32>
      %cst_45 = arith.constant dense<0.000000e+00> : vector<1xf32>
      %89 = vector.multi_reduction <add>, %88, %cst_45 [0] : vector<32x1xf32> to vector<1xf32>
      %90 = vector.shape_cast %89 : vector<1xf32> to vector<1x1xf32>
      %91 = vector.broadcast %74 : f32 to vector<1x1xf32>
      %92 = arith.mulf %90, %91 : vector<1x1xf32>
      %93 = vector.shape_cast %87 : vector<1x1xf32> to vector<1x1xf32>
      %94 = vector.broadcast %93 : vector<1x1xf32> to vector<8x128xf32>
      %c0_46 = arith.constant 0 : index
      %c0_47 = arith.constant 0 : index
      %95 = vector.load %arg9[%c0_46, %c0_47] : memref<8x128xf32, #tpu.memory_space<vmem>>, vector<8x128xf32>
      tpu.vector_store %arg9[%c0_46, %c0_47], %94 {strides = array<i32>} : memref<8x128xf32, #tpu.memory_space<vmem>>, vector<8x128xf32>,
      %96 = vector.shape_cast %92 : vector<1x1xf32> to vector<1x1xf32>
      %97 = vector.broadcast %96 : vector<1x1xf32> to vector<8x128xf32>
      %c0_48 = arith.constant 0 : index
      %c0_49 = arith.constant 0 : index
      %98 = vector.load %arg10[%c0_48, %c0_49] : memref<8x128xf32, #tpu.memory_space<vmem>>, vector<8x128xf32>
      tpu.vector_store %arg10[%c0_48, %c0_49], %97 {strides = array<i32>} : memref<8x128xf32, #tpu.memory_space<vmem>>, vector<8x128xf32>,
    } else {
    }
    return
  }
  func.func @transform_0(%arg0: i32, %arg1: i32, %arg2: memref<1xi32, #tpu.memory_space<smem>>) -> (i32, i32) {
    %c2_i32 = arith.constant 2 : i32
    %0 = arith.muli %arg0, %c2_i32 : i32
    %1 = arith.addi %0, %arg1 : i32
    %c0_i32 = arith.constant 0 : i32
    %c0_i32_0 = arith.constant 0 : i32
    return %1, %c0_i32 : i32, i32
  }
  func.func @transform_1(%arg0: i32, %arg1: i32, %arg2: memref<1xi32, #tpu.memory_space<smem>>) -> (i32, i32) {
    %c2_i32 = arith.constant 2 : i32
    %0 = arith.muli %arg0, %c2_i32 : i32
    %1 = arith.addi %0, %arg1 : i32
    %c0_i32 = arith.constant 0 : i32
    %c0_i32_0 = arith.constant 0 : i32
    return %1, %c0_i32 : i32, i32
  }
  func.func @transform_2(%arg0: i32, %arg1: i32, %arg2: memref<1xi32, #tpu.memory_space<smem>>) -> (i32, i32) {
    %c2_i32 = arith.constant 2 : i32
    %0 = arith.muli %arg0, %c2_i32 : i32
    %1 = arith.addi %0, %arg1 : i32
    %c0_i32 = arith.constant 0 : i32
    %c0_i32_0 = arith.constant 0 : i32
    return %1, %c0_i32 : i32, i32
  }
  func.func @transform_3(%arg0: i32, %arg1: i32, %arg2: memref<1xi32, #tpu.memory_space<smem>>) -> (i32, i32) {
    %c0_i32 = arith.constant 0 : i32
    %c0_i32_0 = arith.constant 0 : i32
    %c0_i32_1 = arith.constant 0 : i32
    return %c0_i32, %c0_i32_0 : i32, i32
  }
  func.func @transform_4(%arg0: i32, %arg1: i32, %arg2: memref<1xi32, #tpu.memory_space<smem>>) -> (i32, i32) {
    %c0_i32 = arith.constant 0 : i32
    %c0_i32_0 = arith.constant 0 : i32
    %c0_i32_1 = arith.constant 0 : i32
    return %c0_i32, %c0_i32_0 : i32, i32
  }
  func.func @transform_5(%arg0: i32, %arg1: i32, %arg2: memref<1xi32, #tpu.memory_space<smem>>) -> (i32, i32) {
    %c0_i32 = arith.constant 0 : i32
    %c0_i32_0 = arith.constant 0 : i32
    return %arg0, %c0_i32 : i32, i32
  }
  func.func @transform_6(%arg0: i32, %arg1: i32, %arg2: memref<1xi32, #tpu.memory_space<smem>>) -> (i32, i32) {
    %c0_i32 = arith.constant 0 : i32
    %c0_i32_0 = arith.constant 0 : i32
    return %arg0, %c0_i32 : i32, i32
  }
  func.func @transform_7(%arg0: i32, %arg1: i32, %arg2: memref<1xi32, #tpu.memory_space<smem>>) -> (i32, i32) {
    %c0_i32 = arith.constant 0 : i32
    %c0_i32_0 = arith.constant 0 : i32
    return %arg0, %c0_i32 : i32, i32
  }
}

</mosaic_0001>

<bundles_post_ra>
// kernel: tpu_custom_call.1
= control target key start
LH: loop header
LB: loop body
LE: loop exit
PB: predicated region body
PF: predicated region fallthrough
CT: control target
= control target key end

     0   :  { %s2725_s0 = inlined_call_operand.<no memory space> [shape: s32[1], index: 0, kind: input, shape index: {}]   ;;  %s2726_s1 = inlined_call_operand.vmem [shape: s32[128,1], index: 1, kind: input, shape index: {}]   ;;  %s2727_s2 = inlined_call_operand.vmem [shape: s32[128,1], index: 2, kind: input, shape index: {}]   ;;  %s2728_s3 = inlined_call_operand.vmem [shape: s32[128,1], index: 3, kind: input, shape index: {}]   ;;  %s2729_s4 = inlined_call_operand.vmem [shape: f32[128,128], index: 4, kind: input, shape index: {}]   ;;  %s2730_s5 = inlined_call_operand.vmem [shape: f32[128,128], index: 5, kind: input, shape index: {}]   ;;  %s2731_s6 = inlined_call_operand.hbm [shape: f32[16,128], index: 6, kind: output, shape index: {0}]   ;;  %s2732_s7 = inlined_call_operand.hbm [shape: f32[16,128], index: 7, kind: output, shape index: {1}]   ;;  %s2733_s8 = inlined_call_operand.hbm [shape: f32[16,128], index: 8, kind: output, shape index: {2}]  }
   0x1   :  { %14 = sst [smem:[#allocation8]] %s2725_s0 }
   0x2   :  { %15 = vsyncpa [#allocation10], 0 }
   0x3   :  { %17 = vsyncpa [#allocation10 + $0x1], 0 }
   0x4   :  { %18 = vsyncpa [#allocation12], 0 }
   0x5   :  { %20 = vsyncpa [#allocation12 + $0x1], 0  ;;  %s1986_s29 = smov 0   ;;  %s1988_s30 = smov 0  }
   0x6   :  { %s1990_s9 = smov 0   ;;  %s1992_s10 = smov 0  }
   0x7   :  { %s1994_s11 = smov 0   ;;  %s1996_s12 = smov 0  }
   0x8   :  { %s1998_s13 = smov 0   ;;  %s2000_s14 = smov 0  }
   0x9 LB: > { %2741 = sst [smem:[#allocation16_spill]] %s1911_s9  ;;  %s2735_s0 = sadd.s32 4294967295, %s1931_s14   ;;  %s1931_s14 = sphi %s2000_s14, %s26_s14   ;;  %s1927_s13 = sphi %s1998_s13, %s2757_s13   ;;  %s1923_s12 = sphi %s1996_s12, %s2756_s12   ;;  %s1919_s11 = sphi %s1994_s11, %s2755_s11   ;;  %s1915_s10 = sphi %s1992_s10, %s2754_s10   ;;  %s1911_s9 = sphi %s1990_s9, %s2753_s9   ;;  %s1907_s30 = sphi %s1988_s30, %s2759_s30   ;;  %s1903_s29 = sphi %s1986_s29, %s2758_s29  }
   0xa   : > { %2742 = sst [smem:[#allocation17_spill]] %s1923_s12  ;;  %s2734_s15 = sadd.s32 4294967294, %s1931_s14  }
   0xb   : > { %2743 = sst [smem:[#allocation18_spill]] %s1927_s13  ;;  %s35_s16 = sadd.s32 1, %s1923_s12 }
   0xc   : > { %p36_p0 = scmp.ge.s32.totalorder %s35_s16, 2  ;;  %s38_s17 = sadd.s32 1, %s1927_s13 }
   0xd   : > { %p187_p1 = scmp.ne.s32.totalorder %s1911_s9, %s1907_s30  ;;  %p188_p2 = scmp.eq.s32.totalorder %s2735_s0, 3 }
   0xe   : > { %s2761_s16 = smov (%p36_p0, %s35_s16), 0  ;;  %s2763_s17 = smov (!%p36_p0, %s38_s17), %s1927_s13 }
   0xf   : > { %2744 = sst [smem:[#allocation19_spill]] %s2761_s16  ;;  %p2037_p3 = por %p188_p2, %p187_p1 }
  0x10   : > { %p193_p4 = scmp.ne.s32.totalorder %s1907_s30, %s1903_s29  ;;  %p40_p5 = scmp.ge.s32.totalorder %s2763_s17, 2 }
  0x11   : > { %p194_p6 = scmp.eq.s32.totalorder %s2734_s15, 3  ;;  %p1553_p7 = scmp.ge.s32.totalorder %s1931_s14, 1 }
  0x12   : > { %p309_p8 = scmp.lt.s32.totalorder %s1931_s14, 5  ;;  %s2765_s17 = smov (%p40_p5, %s2763_s17), 0 }
  0x13   : > { %2746 = sst [smem:[#allocation20_spill]] %s2765_s17  ;;  %p2049_p9 = por %p194_p6, %p193_p4 }
  0x14   : > { %p310_p10 = pnand %p1553_p7, %p309_p8  ;;  %s174_s20 = ssub.s32 %s1927_s13, %s2765_s17 }
  0x15   : > { %s177_s21 = sadd.s32 1, %s1911_s9  ;;  %p175_p11 = scmp.eq.s32.totalorder %s174_s20, 0 }
  0x16   : > { %313 = sbr.rel (%p310_p10) target bundleno = 1094 (0x446), region = 40  ;;  %s2737_s23 = sand.u32 (!%p310_p10), 1, %s1907_s30  }
  0x17   : > { %s2057_s22 = scalar_select %p175_p11, %s1911_s9, %s177_s21  }
  0x18   : > { %s1557_s24 = sshll.u32 (!%p310_p10), %s1919_s11, 1  ;;  %s2063_s25 = sshll.u32 (!%p310_p10), %s2737_s23, 3 }
  0x19   : > { %2748 = sst [smem:[#allocation21_spill]] %s2057_s22  ;;  %s2066_s26 = sadd.s32 (!%p310_p10), %s1915_s10, %s1557_s24 }
  0x1a   : > { %s1558_s27 = sshll.u32 (!%p310_p10), %s2066_s26, 2  ;;  %s352_s12 = scalar_lea.vmem (!%p310_p10), [#allocation9], %s2063_s25 }
  0x1b   : > { %p370_p12 = scmp.lt.s32.totalorder %s1558_s27, 15  ;;  %s359_s22 = scalar_lea.vmem [#allocation11], %s2063_s25 }
  0x1c   : > { %s366_s9 = scalar_lea.vmem [#allocation13], %s2063_s25  ;;  %p1566_p13 = scmp.ne.s32.totalorder %s1915_s10, 0 }
  0x1d   : > { %s2767_s27 = smov (!%p370_p12, %s1558_s27), 15 }
  0x1e   : > { %s1559_s28 = sshll.u32 %s2767_s27, 3  ;;  %400 = sbr.rel (%p1566_p13) target bundleno = 435 (0x1b3), region = 44 }
  0x1f   : > { %s2072_s15 = scalar_lea.vmem %s2726_s1, %s1559_s28  ;;  %s2077_s23 = scalar_lea.vmem %s2727_s2, %s1559_s28 }
  0x20   : > { %s2082_s24 = scalar_lea.vmem %s2728_s3, %s1559_s28 }
  0x23   : > { %v2091_v0 = vld [vmem:[%s2729_s4 + $0x78] sm:$0xff]  ;;  %v2105_v2 = vld [vmem:[%s2729_s4 + $0x70] sm:$0xff]  ;;  %v2119_v4 = vld [vmem:[%s2729_s4 + $0x68] sm:$0xff]  ;;  %vm682_vm0 = vcmask 7168   ;;  %v1933_v32 = vmov 0.0   ;;  %v482_v33 = vlaneseq }
  0x24   : > { %v2096_v1 = vld [vmem:[%s2730_s5 + $0x78] sm:$0xff]  ;;  %417 = vmatpush.xpose.msra.mxu0 %v2091_v0  ;;  %1618 = vmatpush.xpose.msra.mxu2 %v2091_v0  ;;  %v2110_v3 = vld [vmem:[%s2730_s5 + $0x70] sm:$0xff]  ;;  %v2124_v5 = vld [vmem:[%s2730_s5 + $0x68] sm:$0xff]  ;;  %683 = vst.msk [vmem:[#allocation4] sm:$0xff] %vm682_vm0, %v1933_v32 }
  0x25   : > { %703 = vmatpush.xpose.msra.mxu1 %v2096_v1  ;;  %1634 = vmatpush.xpose.msra.mxu3 %v2096_v1  ;;  %v2133_v6 = vld [vmem:[%s2729_s4 + $0x60] sm:$0xff]  ;;  %v2147_v8 = vld [vmem:[%s2729_s4 + $0x58] sm:$0xff]  ;;  %v2161_v10 = vld [vmem:[%s2729_s4 + $0x50] sm:$0xff]  ;;  %684 = vst.msk [vmem:[#allocation4 + $0x8] sm:$0xff] %vm682_vm0, %v1933_v32  ;;  %v2286_v34 = vshrl.u32 %v482_v33, 7  ;;  %v2288_v35 = vand.u32 127, %v482_v33 }
  0x26   : > { %v2138_v7 = vld [vmem:[%s2730_s5 + $0x60] sm:$0xff]  ;;  %v2152_v9 = vld [vmem:[%s2730_s5 + $0x58] sm:$0xff]  ;;  %v2166_v11 = vld [vmem:[%s2730_s5 + $0x50] sm:$0xff]  ;;  %685 = vst.msk [vmem:[#allocation4 + $0x10] sm:$0xff] %vm682_vm0, %v1933_v32 }
  0x27   : > { %v2175_v12 = vld [vmem:[%s2729_s4 + $0x48] sm:$0xff]  ;;  %v409_v14 = vld [vmem:[%s2729_s4 + $0x40] sm:$0xff]  ;;  %v2195_v16 = vld [vmem:[%s2729_s4 + $0x38] sm:$0xff]  ;;  %686 = vst.msk [vmem:[#allocation4 + $0x18] sm:$0xff] %vm682_vm0, %v1933_v32  ;;  %vm501_vm1 = vcmp.eq.s32.totalorder %v2286_v34, %v2288_v35  ;;  %v491_v36 = vadd.s32 64, %v2286_v34  ;;  %v484_v43 = vadd.s32 8, %v2286_v34 }
  0x28   : > { %418 = vmatpush.xpose.msra.mxu0 %v2105_v2  ;;  %1619 = vmatpush.xpose.msra.mxu2 %v2105_v2  ;;  %v2180_v13 = vld [vmem:[%s2730_s5 + $0x48] sm:$0xff]  ;;  %v695_v15 = vld [vmem:[%s2730_s5 + $0x40] sm:$0xff]  ;;  %v2200_v17 = vld [vmem:[%s2730_s5 + $0x38] sm:$0xff]  ;;  %901 = vst.msk [vmem:[#allocation5] sm:$0xff] %vm682_vm0, %v1933_v32  ;;  %v1567_v37 = vsel %vm501_vm1, 1.0, %v1933_v32  ;;  %v492_v45 = vadd.s32 72, %v2286_v34 }
  0x29   : > { %704 = vmatpush.xpose.msra.mxu1 %v2110_v3  ;;  %1635 = vmatpush.xpose.msra.mxu3 %v2110_v3  ;;  %v2209_v18 = vld [vmem:[%s2729_s4 + $0x30] sm:$0xff]  ;;  %v406_v20 = vld [vmem:[%s2729_s4 + $0x28] sm:$0xff]  ;;  %v405_v22 = vld [vmem:[%s2729_s4 + $0x20] sm:$0xff]  ;;  %902 = vst.msk [vmem:[#allocation5 + $0x8] sm:$0xff] %vm682_vm0, %v1933_v32  ;;  %vm509_vm2 = vcmp.eq.s32.totalorder %v491_v36, %v2288_v35  ;;  %vm502_vm3 = vcmp.eq.s32.totalorder %v484_v43, %v2288_v35  ;;  %v493_v54 = vadd.s32 80, %v2286_v34  ;;  %v485_v55 = vadd.s32 16, %v2286_v34 }
  0x2a   : > { %v2214_v19 = vld [vmem:[%s2730_s5 + $0x30] sm:$0xff]  ;;  %v692_v21 = vld [vmem:[%s2730_s5 + $0x28] sm:$0xff]  ;;  %v691_v23 = vld [vmem:[%s2730_s5 + $0x20] sm:$0xff]  ;;  %903 = vst.msk [vmem:[#allocation5 + $0x10] sm:$0xff] %vm682_vm0, %v1933_v32  ;;  %v1575_v42 = vsel %vm509_vm2, 1.0, %v1933_v32  ;;  %vm510_vm4 = vcmp.eq.s32.totalorder %v492_v45, %v2288_v35  ;;  %v1568_v51 = vsel %vm502_vm3, 1.0, %v1933_v32 }
  0x2b   : > { %v404_v24 = vld [vmem:[%s2729_s4 + $0x18] sm:$0xff]  ;;  %v403_v26 = vld [vmem:[%s2729_s4 + $0x10] sm:$0xff]  ;;  %v402_v28 = vld [vmem:[%s2729_s4 + $0x8] sm:$0xff]  ;;  %904 = vst.msk [vmem:[#allocation5 + $0x18] sm:$0xff] %vm682_vm0, %v1933_v32  ;;  %v1576_v52 = vsel %vm510_vm4, 1.0, %v1933_v32  ;;  %vm511_vm5 = vcmp.eq.s32.totalorder %v493_v54, %v2288_v35  ;;  %vm503_vm6 = vcmp.eq.s32.totalorder %v485_v55, %v2288_v35  ;;  %v490_v33 = vadd.s32 56, %v2286_v34 }
  0x2c   : > { %419 = vmatpush.xpose.msra.mxu0 %v2119_v4  ;;  %1620 = vmatpush.xpose.msra.mxu2 %v2119_v4  ;;  %v690_v25 = vld [vmem:[%s2730_s5 + $0x18] sm:$0xff]  ;;  %v689_v27 = vld [vmem:[%s2730_s5 + $0x10] sm:$0xff]  ;;  %v688_v29 = vld [vmem:[%s2730_s5 + $0x8] sm:$0xff]  ;;  %905 = vst.msk [vmem:[#allocation6] sm:$0xff] %vm682_vm0, %v1933_v32  ;;  %v1577_v62 = vsel %vm511_vm5, 1.0, %v1933_v32  ;;  %v1569_v63 = vsel %vm503_vm6, 1.0, %v1933_v32 }
  0x2d   : > { %705 = vmatpush.xpose.msra.mxu1 %v2124_v5  ;;  %1636 = vmatpush.xpose.msra.mxu3 %v2124_v5  ;;  %v401_v30 = vld [vmem:[%s2729_s4] sm:$0xff]  ;;  %906 = vst.msk [vmem:[#allocation6 + $0x8] sm:$0xff] %vm682_vm0, %v1933_v32  ;;  %vm508_vm13 = vcmp.eq.s32.totalorder %v490_v33, %v2288_v35 }
  0x2e   : > { %v687_v31 = vld [vmem:[%s2730_s5] sm:$0xff]  ;;  %907 = vst.msk [vmem:[#allocation6 + $0x10] sm:$0xff] %vm682_vm0, %v1933_v32 }
  0x2f   : > { %908 = vst.msk [vmem:[#allocation6 + $0x18] sm:$0xff] %vm682_vm0, %v1933_v32 }
  0x30   : > { %420 = vmatpush.xpose.msra.mxu0 %v2133_v6  ;;  %1621 = vmatpush.xpose.msra.mxu2 %v2133_v6 }
  0x31   : > { %706 = vmatpush.xpose.msra.mxu1 %v2138_v7  ;;  %1637 = vmatpush.xpose.msra.mxu3 %v2138_v7 }
  0x34   : > { %421 = vmatpush.xpose.msra.mxu0 %v2147_v8  ;;  %1622 = vmatpush.xpose.msra.mxu2 %v2147_v8 }
  0x35   : > { %707 = vmatpush.xpose.msra.mxu1 %v2152_v9  ;;  %1638 = vmatpush.xpose.msra.mxu3 %v2152_v9 }
  0x38   : > { %422 = vmatpush.xpose.msra.mxu0 %v2161_v10  ;;  %1623 = vmatpush.xpose.msra.mxu2 %v2161_v10 }
  0x39   : > { %708 = vmatpush.xpose.msra.mxu1 %v2166_v11  ;;  %1639 = vmatpush.xpose.msra.mxu3 %v2166_v11 }
  0x3c   : > { %423 = vmatpush.xpose.msra.mxu0 %v2175_v12  ;;  %1624 = vmatpush.xpose.msra.mxu2 %v2175_v12 }
  0x3d   : > { %709 = vmatpush.xpose.msra.mxu1 %v2180_v13  ;;  %1640 = vmatpush.xpose.msra.mxu3 %v2180_v13 }
  0x40   : > { %424 = vmatpush.xpose.msra.mxu0 %v409_v14  ;;  %1625 = vmatpush.xpose.msra.mxu2 %v409_v14 }
  0x41   : > { %710 = vmatpush.xpose.msra.mxu1 %v695_v15  ;;  %1641 = vmatpush.xpose.msra.mxu3 %v695_v15 }
  0x44   : > { %425 = vmatpush.xpose.msra.mxu0 %v2195_v16  ;;  %1626 = vmatpush.xpose.msra.mxu2 %v2195_v16 }
  0x45   : > { %711 = vmatpush.xpose.msra.mxu1 %v2200_v17  ;;  %1642 = vmatpush.xpose.msra.mxu3 %v2200_v17 }
  0x48   : > { %426 = vmatpush.xpose.msra.mxu0 %v2209_v18  ;;  %1627 = vmatpush.xpose.msra.mxu2 %v2209_v18 }
  0x49   : > { %712 = vmatpush.xpose.msra.mxu1 %v2214_v19  ;;  %1643 = vmatpush.xpose.msra.mxu3 %v2214_v19 }
  0x4c   : > { %427 = vmatpush.xpose.msra.mxu0 %v406_v20  ;;  %1628 = vmatpush.xpose.msra.mxu2 %v406_v20 }
  0x4d   : > { %713 = vmatpush.xpose.msra.mxu1 %v692_v21  ;;  %1644 = vmatpush.xpose.msra.mxu3 %v692_v21 }
  0x50   : > { %428 = vmatpush.xpose.msra.mxu0 %v405_v22  ;;  %1629 = vmatpush.xpose.msra.mxu2 %v405_v22 }
  0x51   : > { %714 = vmatpush.xpose.msra.mxu1 %v691_v23  ;;  %1645 = vmatpush.xpose.msra.mxu3 %v691_v23 }
  0x54   : > { %429 = vmatpush.xpose.msra.mxu0 %v404_v24  ;;  %1630 = vmatpush.xpose.msra.mxu2 %v404_v24 }
  0x55   : > { %715 = vmatpush.xpose.msra.mxu1 %v690_v25  ;;  %1646 = vmatpush.xpose.msra.mxu3 %v690_v25 }
  0x58   : > { %430 = vmatpush.xpose.msra.mxu0 %v403_v26  ;;  %1631 = vmatpush.xpose.msra.mxu2 %v403_v26 }
  0x59   : > { %716 = vmatpush.xpose.msra.mxu1 %v689_v27  ;;  %1647 = vmatpush.xpose.msra.mxu3 %v689_v27 }
  0x5c   : > { %431 = vmatpush.xpose.msra.mxu0 %v402_v28  ;;  %1632 = vmatpush.xpose.msra.mxu2 %v402_v28 }
  0x5d   : > { %717 = vmatpush.xpose.msra.mxu1 %v688_v29  ;;  %1648 = vmatpush.xpose.msra.mxu3 %v688_v29 }
  0x60   : > { %432 = vmatpush.xpose.msra.mxu0 %v401_v30  ;;  %1633 = vmatpush.xpose.msra.mxu2 %v401_v30 }
  0x61   : > { %718 = vmatpush.xpose.msra.mxu1 %v687_v31  ;;  %1649 = vmatpush.xpose.msra.mxu3 %v687_v31 }
  0x63   : > { %433 = vmatmul.f32.vlgmr.msra.gmra.mxu0 %v401_v30  ;;  %457 = vmatmul.f32.vlgmr.msra.gmra.mxu2 %v409_v14 }
  0x64   : > { %719 = vmatmul.f32.vlgmr.msra.gmra.mxu1 %v687_v31  ;;  %743 = vmatmul.f32.vlgmr.msra.gmra.mxu3 %v695_v15 }
  0x6b   : > { %436 = vmatmul.f32.gmra.mxu0 %v402_v28  ;;  %460 = vmatmul.f32.gmra.mxu2 %v2175_v12  ;;  %v487_v12 = vadd.s32 32, %v2286_v34  ;;  %v489_v28 = vadd.s32 48, %v2286_v34 }
  0x6c   : > { %722 = vmatmul.f32.gmra.mxu1 %v688_v29  ;;  %746 = vmatmul.f32.gmra.mxu3 %v2180_v13 }
  0x6d   : > { %vm505_vm9 = vcmp.eq.s32.totalorder %v487_v12, %v2288_v35  ;;  %vm507_vm12 = vcmp.eq.s32.totalorder %v489_v28, %v2288_v35 }
  0x6e   : > { %v1573_v55 = vsel %vm507_vm12, 1.0, %v1933_v32 }
  0x73   : > { %439 = vmatmul.f32.gmra.mxu0 %v403_v26  ;;  %463 = vmatmul.f32.gmra.mxu2 %v2161_v10 }
  0x74   : > { %725 = vmatmul.f32.gmra.mxu1 %v689_v27  ;;  %749 = vmatmul.f32.gmra.mxu3 %v2166_v11  ;;  %v486_v11 = vadd.s32 24, %v2286_v34  ;;  %v488_v27 = vadd.s32 40, %v2286_v34 }
  0x76   : > { %vm504_vm8 = vcmp.eq.s32.totalorder %v486_v11, %v2288_v35  ;;  %vm506_vm11 = vcmp.eq.s32.totalorder %v488_v27, %v2288_v35 }
  0x77   : > { %v1572_v45 = vsel %vm506_vm11, 1.0, %v1933_v32 }
  0x7b   : > { %442 = vmatmul.f32.gmra.mxu0 %v404_v24  ;;  %466 = vmatmul.f32.gmra.mxu2 %v2147_v8 }
  0x7c   : > { %728 = vmatmul.f32.gmra.mxu1 %v690_v25  ;;  %752 = vmatmul.f32.gmra.mxu3 %v2152_v9 }
  0x83   : > { %445 = vmatmul.f32.gmra.mxu0 %v405_v22  ;;  %469 = vmatmul.f32.gmra.mxu2 %v2133_v6 }
  0x84   : > { %731 = vmatmul.f32.gmra.mxu1 %v691_v23  ;;  %755 = vmatmul.f32.gmra.mxu3 %v2138_v7 }
  0x8b   : > { %448 = vmatmul.f32.gmra.mxu0 %v406_v20  ;;  %472 = vmatmul.f32.gmra.mxu2 %v2119_v4  ;;  %v495_v20 = vadd.s32 96, %v2286_v34 }
  0x8c   : > { %734 = vmatmul.f32.gmra.mxu1 %v692_v21  ;;  %758 = vmatmul.f32.gmra.mxu3 %v2124_v5 }
  0x8d   : > { %vm513_vm10 = vcmp.eq.s32.totalorder %v495_v20, %v2288_v35 }
  0x8e   : > { %v1579_v29 = vsel %vm513_vm10, 1.0, %v1933_v32 }
  0x93   : > { %451 = vmatmul.f32.gmra.mxu0 %v2209_v18  ;;  %475 = vmatmul.f32.gmra.mxu2 %v2105_v2  ;;  %v1570_v18 = vsel %vm504_vm8, 1.0, %v1933_v32 }
  0x94   : > { %737 = vmatmul.f32.gmra.mxu1 %v2214_v19  ;;  %761 = vmatmul.f32.gmra.mxu3 %v2110_v3  ;;  %v1571_v19 = vsel %vm505_vm9, 1.0, %v1933_v32 }
  0x9b   : > { %454 = vmatmul.f32.gmra.mxu0 %v2195_v16  ;;  %478 = vmatmul.f32.gmra.mxu2 %v2091_v0  ;;  %v494_v0 = vadd.s32 88, %v2286_v34 }
  0x9c   : > { %740 = vmatmul.f32.gmra.mxu1 %v2200_v17  ;;  %764 = vmatmul.f32.gmra.mxu3 %v2096_v1 }
  0x9d   : > { %vm512_vm7 = vcmp.eq.s32.totalorder %v494_v0, %v2288_v35  ;;  %v497_v0 = vadd.s32 112, %v2286_v34 }
  0x9e   : > { %v1578_v8 = vsel %vm512_vm7, 1.0, %v1933_v32 }
  0x9f   : > { %vm515_vm15 = vcmp.eq.s32.totalorder %v497_v0, %v2288_v35 }
  0xe0   : > { %v2294_v38 = vpop.f32.mrf.mxu0 }
  0xe1   : > { %v2296_v39 = vpop.f32.mrf.mxu1  ;;  %v2299_v40 = vmul.f32 %v1567_v37, %v2294_v38 }
  0xe2   : > { %v2303_v41 = vmul.f32 %v1567_v37, %v2296_v39 }
  0xe3   : > { %565 = vadd.xlane.f32.xlu0 %v2299_v40 }
  0xe4   : > { %784 = vadd.xlane.f32.xlu1 %v2303_v41 }
  0xe6   : > { %v2309_v44 = vpop.f32.mrf.mxu2 }
  0xe7   : > { %v2312_v46 = vpop.f32.mrf.mxu3  ;;  %v2315_v47 = vmul.f32 %v1575_v42, %v2309_v44 }
  0xe8   : > { %v2317_v48 = vpop.f32.mrf.mxu0  ;;  %v2323_v50 = vmul.f32 %v1575_v42, %v2312_v46 }
  0xe9   : > { %v2319_v49 = vpop.f32.mrf.mxu1  ;;  %581 = vadd.xlane.f32.xlu2 %v2315_v47  ;;  %v550_v61 = vmul.f32 %v1568_v51, %v2317_v48 }
  0xea   : > { %v769_v57 = vmul.f32 %v1568_v51, %v2319_v49 }
  0xeb   : > { %800 = vadd.xlane.f32.xlu0 %v2323_v50  ;;  %v597_v30 = vadd.f32 %v550_v61, %v2299_v40 }
  0xec   : > { %v816_v36 = vadd.f32 %v769_v57, %v2303_v41 }
  0xee   : > { %v2330_v53 = vpop.f32.mrf.mxu2 }
  0xef   : > { %v2334_v56 = vpop.f32.mrf.mxu3  ;;  %v2364_v7 = vmul.f32 %v1576_v52, %v2330_v53 }
  0xf0   : > { %v2337_v58 = vpop.f32.mrf.mxu0  ;;  %v2340_v59 = vmul.f32 %v1576_v52, %v2334_v56 }
  0xf1   : > { %v2342_v60 = vpop.f32.mrf.mxu1  ;;  %786 = vadd.xlane.f32.xlu2 %v769_v57  ;;  %v551_v5 = vmul.f32 %v1569_v63, %v2337_v58 }
  0xf2   : > { %802 = vadd.xlane.f32.xlu1 %v2340_v59  ;;  %v770_v16 = vmul.f32 %v1569_v63, %v2342_v60  ;;  %v496_v63 = vadd.s32 104, %v2286_v34 }
  0xf3   : > { %567 = vadd.xlane.f32.xlu0 %v550_v61  ;;  %v598_v51 = vadd.f32 %v597_v30, %v551_v5 }
  0xf4   : > { %v817_v54 = vadd.f32 %v816_v36, %v770_v16  ;;  %vm514_vm14 = vcmp.eq.s32.totalorder %v496_v63, %v2288_v35 }
  0xf6   : > { %v2351_v1 = vpop.f32.mrf.mxu2 }
  0xf7   : > { %v2353_v2 = vpop.f32.mrf.mxu3  ;;  %v2373_v10 = vmul.f32 %v1577_v62, %v2351_v1 }
  0xf8   : > { %v2355_v3 = vpop.f32.mrf.mxu0  ;;  %v2358_v4 = vmul.f32 %v1577_v62, %v2353_v2 }
  0xf9   : > { %v2361_v6 = vpop.f32.mrf.mxu1  ;;  %v552_v24 = vmul.f32 %v1570_v18, %v2355_v3 }
  0xfa   : > { %804 = vadd.xlane.f32.xlu2 %v2358_v4  ;;  %569 = vadd.xlane.f32.xlu1 %v551_v5  ;;  %v771_v42 = vmul.f32 %v1570_v18, %v2361_v6 }
  0xfb   : > { %583 = vadd.xlane.f32.xlu0 %v2364_v7  ;;  %v599_v61 = vadd.f32 %v598_v51, %v552_v24 }
  0xfc   : > { %v818_v57 = vadd.f32 %v817_v54, %v771_v42 }
  0xfe   : > { %v2370_v9 = vpop.f32.mrf.mxu2 }
  0xff   : > { %v2378_v13 = vmul.f32 %v1578_v8, %v2370_v9  ;;  %v2389_v17 = vpop.f32.mrf.mxu3 }
 0x100   : > { %v2380_v14 = vpop.f32.mrf.mxu0  ;;  %v2395_v21 = vmul.f32 %v1578_v8, %v2389_v17 }
 0x101   : > { %v2382_v15 = vpop.f32.mrf.mxu1  ;;  %v553_v25 = vmul.f32 %v1571_v19, %v2380_v14 }
 0x102   : > { %587 = vadd.xlane.f32.xlu2 %v2378_v13  ;;  %585 = vadd.xlane.f32.xlu1 %v2373_v10  ;;  %v772_v43 = vmul.f32 %v1571_v19, %v2382_v15 }
 0x103   : > { %788 = vadd.xlane.f32.xlu0 %v770_v16  ;;  %v600_v5 = vadd.f32 %v599_v61, %v553_v25  ;;  %v1574_v16 = vsel %vm508_vm13, 1.0, %v1933_v32 }
 0x104   : > { %v819_v12 = vadd.f32 %v818_v57, %v772_v43 }
 0x106   : > { %v2397_v22 = vpop.f32.mrf.mxu2 }
 0x107   : > { %v2413_v31 = vmul.f32 %v1579_v29, %v2397_v22  ;;  %v2434_v8 = vpop.f32.mrf.mxu3 }
 0x108   : > { %v2399_v23 = vpop.f32.mrf.mxu0  ;;  %v780_v18 = vmul.f32 %v1579_v29, %v2434_v8 }
 0x109   : > { %v2403_v26 = vpop.f32.mrf.mxu1  ;;  %v554_v41 = vmul.f32 %v1572_v45, %v2399_v23 }
 0x10a   : > { %571 = vadd.xlane.f32.xlu1 %v552_v24  ;;  %573 = vadd.xlane.f32.xlu2 %v553_v25  ;;  %v773_v62 = vmul.f32 %v1572_v45, %v2403_v26 }
 0x10b   : > { %806 = vadd.xlane.f32.xlu0 %v2395_v21  ;;  %v601_v20 = vadd.f32 %v600_v5, %v554_v41 }
 0x10c   : > { %v820_v27 = vadd.f32 %v819_v12, %v773_v62 }
 0x10e   : > { %v2425_v40 = vpop.f32.mrf.mxu2 }
 0x10f   : > { %v2459_v0 = vpop.f32.mrf.mxu3 }
 0x110   : > { %v2418_v37 = vpop.f32.mrf.mxu0 }
 0x111   : > { %v2423_v52 = vpop.f32.mrf.mxu1  ;;  %v555_v11 = vmul.f32 %v1573_v55, %v2418_v37 }
 0x112   : > { %790 = vadd.xlane.f32.xlu1 %v771_v42  ;;  %792 = vadd.xlane.f32.xlu2 %v772_v43  ;;  %v774_v19 = vmul.f32 %v1573_v55, %v2423_v52  ;;  %v1580_v42 = vsel %vm514_vm14, 1.0, %v1933_v32  ;;  %v1581_v43 = vsel %vm515_vm15, 1.0, %v1933_v32  ;;  %v498_v55 = vadd.s32 120, %v2286_v34 }
 0x113   : > { %589 = vadd.xlane.f32.xlu0 %v2413_v31  ;;  %v602_v30 = vadd.f32 %v601_v20, %v555_v11  ;;  %v562_v61 = vmul.f32 %v1580_v42, %v2425_v40 }
 0x114   : > { %v821_v29 = vadd.f32 %v820_v27, %v774_v19  ;;  %vm516_vm0 = vcmp.eq.s32.totalorder %v498_v55, %v2288_v35 }
 0x116   : > { %v2448_v36 = vpop.f32.mrf.mxu2 }
 0x117   : > { %v563_v57 = vmul.f32 %v1581_v43, %v2448_v36 }
 0x118   : > { %v2440_v24 = vpop.f32.mrf.mxu0 }
 0x119   : > { %v556_v25 = vmul.f32 %v1574_v16, %v2440_v24  ;;  %v2445_v28 = vpop.f32.mrf.mxu1 }
 0x11a   : > { %v775_v33 = vmul.f32 %v1574_v16, %v2445_v28  ;;  %808 = vadd.xlane.f32.xlu1 %v780_v18  ;;  %575 = vadd.xlane.f32.xlu2 %v554_v41 }
 0x11b   : > { %794 = vadd.xlane.f32.xlu0 %v773_v62  ;;  %v603_v45 = vadd.f32 %v602_v30, %v556_v25 }
 0x11c   : > { %v822_v51 = vadd.f32 %v821_v29, %v775_v33 }
 0x11d   : > { %v604_v54 = vadd.f32 %v603_v45, %v2315_v47 }
 0x11e   : > { %v823_v41 = vadd.f32 %v822_v51, %v2323_v50  ;;  %v2465_v12 = vpop.f32.mrf.mxu2  ;;  %v1582_v50 = vsel %vm516_vm0, 1.0, %v1933_v32 }
 0x11f   : > { %v605_v62 = vadd.f32 %v604_v54, %v2364_v7  ;;  %v564_v7 = vmul.f32 %v1582_v50, %v2465_v12 }
 0x120   : > { %v824_v63 = vadd.f32 %v823_v41, %v2340_v59  ;;  %v2469_v59 = vpop.f32.mrf.mxu3 }
 0x121   : > { %v606_v5 = vadd.f32 %v605_v62, %v2373_v10  ;;  %v781_v10 = vmul.f32 %v1580_v42, %v2459_v0 }
 0x122   : > { %591 = vadd.xlane.f32.xlu1 %v562_v61  ;;  %593 = vadd.xlane.f32.xlu2 %v563_v57  ;;  %v825_v34 = vadd.f32 %v824_v63, %v2358_v4 }
 0x123   : > { %577 = vadd.xlane.f32.xlu0 %v555_v11  ;;  %v607_v47 = vadd.f32 %v606_v5, %v2378_v13  ;;  %v782_v11 = vmul.f32 %v1581_v43, %v2469_v59 }
 0x124   : > { %v826_v35 = vadd.f32 %v825_v34, %v2395_v21  ;;  %v853_v34 = vmul.f32 2.0, %v2296_v39 }
 0x125   : > { %v608_v4 = vadd.f32 %v607_v47, %v2413_v31 }
 0x126   : > { %v827_v13 = vadd.f32 %v826_v35, %v780_v18 }
 0x127   : > { %v609_v32 = vadd.f32 %v608_v4, %v562_v61 }
 0x128   : > { %v2475_v16 = vpop.f32.mrf.mxu3 }
 0x129   : > { %v783_v20 = vmul.f32 %v1582_v50, %v2475_v16  ;;  %v610_v27 = vadd.f32 %v609_v32, %v563_v57  ;;  %v634_v57 = vmul.f32 2.0, %v2294_v38 }
 0x12a   : > { %796 = vadd.xlane.f32.xlu1 %v774_v19  ;;  %798 = vadd.xlane.f32.xlu2 %v775_v33  ;;  %v828_v19 = vadd.f32 %v827_v13, %v781_v10  ;;  %v861_v13 = vmul.f32 2.0, %v2312_v46 }
 0x12b   : > { %595 = vadd.xlane.f32.xlu0 %v564_v7  ;;  %v611_v21 = vadd.f32 %v610_v27, %v564_v7 }
 0x12c   : > { %v829_v30 = vadd.f32 %v828_v19, %v782_v11 }
 0x12d   : > { %v612_v29 = vrot.slane %v611_v21, 4 }
 0x12e   : > { %v830_v33 = vadd.f32 %v829_v30, %v783_v20 }
 0x12f   : > { %v613_v31 = vadd.f32 %v612_v29, %v611_v21  ;;  %v862_v21 = vmul.f32 2.0, %v2334_v56  ;;  %v635_v29 = vmul.f32 2.0, %v2317_v48  ;;  %v643_v48 = vmul.f32 2.0, %v2330_v53 }
 0x130   : > { %v831_v42 = vrot.slane %v830_v33, 4  ;;  %v855_v53 = vmul.f32 2.0, %v2342_v60  ;;  %v864_v60 = vmul.f32 2.0, %v2389_v17  ;;  %v646_v17 = vmul.f32 2.0, %v2397_v22 }
 0x131   : > { %v614_v43 = vrot.slane %v613_v31, 2  ;;  %v858_v22 = vmul.f32 2.0, %v2403_v26  ;;  %v640_v26 = vmul.f32 2.0, %v2418_v37  ;;  %v649_v37 = vmul.f32 2.0, %v2465_v12 }
 0x132   : > { %810 = vadd.xlane.f32.xlu2 %v781_v10  ;;  %579 = vadd.xlane.f32.xlu1 %v556_v25  ;;  %v832_v45 = vadd.f32 %v831_v42, %v830_v33  ;;  %v642_v10 = vmul.f32 2.0, %v2309_v44  ;;  %v867_v12 = vmul.f32 2.0, %v2469_v59 }
 0x133   : > { %812 = vadd.xlane.f32.xlu0 %v782_v11  ;;  %v615_v51 = vadd.f32 %v614_v43, %v613_v31 }
 0x134   : > { %v833_v18 = vrot.slane %v832_v45, 2 }
 0x135   : > { %v616_v54 = vrot.slane %v615_v51, 1 }
 0x136   : > { %v834_v25 = vadd.f32 %v833_v18, %v832_v45  ;;  %v636_v18 = vmul.f32 2.0, %v2337_v58  ;;  %v644_v58 = vmul.f32 2.0, %v2351_v1  ;;  %v637_v1 = vmul.f32 2.0, %v2355_v3 }
 0x137   : > { %v2478_v61 = vadd.f32 %v616_v54, %v615_v51  ;;  %v863_v51 = vmul.f32 2.0, %v2353_v2  ;;  %v645_v2 = vmul.f32 2.0, %v2370_v9  ;;  %v638_v9 = vmul.f32 2.0, %v2380_v14 }
 0x138   : > { %v835_v55 = vrot.slane %v834_v25, 1  ;;  %v856_v3 = vmul.f32 2.0, %v2361_v6  ;;  %v857_v14 = vmul.f32 2.0, %v2382_v15  ;;  %v639_v6 = vmul.f32 2.0, %v2399_v23 }
 0x139   : > { %v865_v15 = vmul.f32 2.0, %v2434_v8  ;;  %v647_v23 = vmul.f32 2.0, %v2425_v40  ;;  %v648_v8 = vmul.f32 2.0, %v2448_v36  ;;  %v859_v40 = vmul.f32 2.0, %v2423_v52 }
 0x13a   : > { %814 = vadd.xlane.f32.xlu1 %v783_v20  ;;  %v2480_v41 = vadd.f32 %v835_v55, %v834_v25  ;;  %v854_v20 = vmul.f32 2.0, %v2319_v49  ;;  %v860_v36 = vmul.f32 2.0, %v2445_v28  ;;  %v641_v52 = vmul.f32 2.0, %v2440_v24 }
 0x13b   : > { %v866_v28 = vmul.f32 2.0, %v2459_v0  ;;  %v868_v24 = vmul.f32 2.0, %v2475_v16 }
 0x156   : > { %v566_v62 = vpop.xlane.xlu0 %565 }
 0x157   : > { %v785_v63 = vpop.xlane.xlu1 %784  ;;  %v618_v5 = vadd.f32 %v2478_v61, %v566_v62 }
 0x158   : > { %v837_v47 = vadd.f32 %v2480_v41, %v785_v63 }
 0x159   : > { %v650_v50 = vsub.f32 %v618_v5, %v634_v57 }
 0x15a   : > { %v869_v7 = vsub.f32 %v837_v47, %v853_v34 }
 0x15b   : > { %666 = vst [vmem:[#allocation2 + $0x30] sm:$0xff] %v650_v50 }
 0x15c   : > { %885 = vst [vmem:[#allocation3 + $0x28] sm:$0xff] %v869_v7  ;;  %v582_v35 = vpop.xlane.xlu2 %581 }
 0x15d   : > { %v626_v4 = vadd.f32 %v2478_v61, %v582_v35 }
 0x15e   : > { %v801_v11 = vpop.xlane.xlu0 %800 }
 0x15f   : > { %v658_v38 = vsub.f32 %v626_v4, %v642_v10  ;;  %v845_v32 = vadd.f32 %v2480_v41, %v801_v11 }
 0x161   : > { %674 = vst [vmem:[#allocation2 + $0x40] sm:$0xff] %v658_v38  ;;  %v877_v19 = vsub.f32 %v845_v32, %v861_v13 }
 0x163   : > { %893 = vst [vmem:[#allocation3 + $0x20] sm:$0xff] %v877_v19 }
 0x164   : > { %v787_v39 = vpop.xlane.xlu2 %786 }
 0x165   : > { %v803_v27 = vpop.xlane.xlu1 %802  ;;  %v838_v30 = vadd.f32 %v2480_v41, %v787_v39 }
 0x166   : > { %v846_v44 = vadd.f32 %v2480_v41, %v803_v27  ;;  %v568_v33 = vpop.xlane.xlu0 %567 }
 0x167   : > { %v870_v46 = vsub.f32 %v838_v30, %v854_v20  ;;  %v619_v42 = vadd.f32 %v2478_v61, %v568_v33 }
 0x168   : > { %v878_v31 = vsub.f32 %v846_v44, %v862_v21 }
 0x169   : > { %886 = vst [vmem:[#allocation3 + $0x68] sm:$0xff] %v870_v46  ;;  %v651_v45 = vsub.f32 %v619_v42, %v635_v29 }
 0x16a   : > { %894 = vst [vmem:[#allocation3 + $0x78] sm:$0xff] %v878_v31 }
 0x16b   : > { %667 = vst [vmem:[#allocation2] sm:$0xff] %v651_v45 }
 0x16d   : > { %v805_v43 = vpop.xlane.xlu2 %804  ;;  %v570_v49 = vpop.xlane.xlu1 %569 }
 0x16e   : > { %v847_v56 = vadd.f32 %v2480_v41, %v805_v43  ;;  %v620_v25 = vadd.f32 %v2478_v61, %v570_v49  ;;  %v584_v54 = vpop.xlane.xlu0 %583 }
 0x16f   : > { %v627_v55 = vadd.f32 %v2478_v61, %v584_v54 }
 0x170   : > { %v879_v62 = vsub.f32 %v847_v56, %v863_v51  ;;  %v652_v57 = vsub.f32 %v620_v25, %v636_v18 }
 0x171   : > { %v659_v63 = vsub.f32 %v627_v55, %v643_v48 }
 0x172   : > { %895 = vst [vmem:[#allocation3 + $0x18] sm:$0xff] %v879_v62 }
 0x173   : > { %668 = vst [vmem:[#allocation2 + $0x58] sm:$0xff] %v652_v57 }
 0x174   : > { %675 = vst [vmem:[#allocation2 + $0x20] sm:$0xff] %v659_v63 }
 0x175   : > { %v588_v5 = vpop.xlane.xlu2 %587  ;;  %v586_v34 = vpop.xlane.xlu1 %585 }
 0x176   : > { %v629_v47 = vadd.f32 %v2478_v61, %v588_v5  ;;  %v628_v50 = vadd.f32 %v2478_v61, %v586_v34  ;;  %v789_v7 = vpop.xlane.xlu0 %788 }
 0x177   : > { %v839_v35 = vadd.f32 %v2480_v41, %v789_v7 }
 0x178   : > { %v661_v10 = vsub.f32 %v629_v47, %v645_v2  ;;  %v660_v4 = vsub.f32 %v628_v50, %v644_v58 }
 0x179   : > { %v871_v11 = vsub.f32 %v839_v35, %v855_v53 }
 0x17a   : > { %677 = vst [vmem:[#allocation2 + $0x38] sm:$0xff] %v661_v10 }
 0x17b   : > { %676 = vst [vmem:[#allocation2 + $0x10] sm:$0xff] %v660_v4 }
 0x17c   : > { %887 = vst [vmem:[#allocation3 + $0x10] sm:$0xff] %v871_v11 }
 0x17d   : > { %v572_v13 = vpop.xlane.xlu1 %571  ;;  %v574_v38 = vpop.xlane.xlu2 %573 }
 0x17e   : > { %v621_v32 = vadd.f32 %v2478_v61, %v572_v13  ;;  %v622_v19 = vadd.f32 %v2478_v61, %v574_v38  ;;  %v807_v39 = vpop.xlane.xlu0 %806 }
 0x17f   : > { %v848_v20 = vadd.f32 %v2480_v41, %v807_v39 }
 0x180   : > { %v653_v27 = vsub.f32 %v621_v32, %v637_v1  ;;  %v654_v30 = vsub.f32 %v622_v19, %v638_v9 }
 0x181   : > { %v880_v21 = vsub.f32 %v848_v20, %v864_v60 }
 0x182   : > { %669 = vst [vmem:[#allocation2 + $0x18] sm:$0xff] %v653_v27 }
 0x183   : > { %670 = vst [vmem:[#allocation2 + $0x50] sm:$0xff] %v654_v30 }
 0x184   : > { %896 = vst [vmem:[#allocation3 + $0x58] sm:$0xff] %v880_v21 }
 0x185   : > { %v791_v44 = vpop.xlane.xlu1 %790  ;;  %v793_v33 = vpop.xlane.xlu2 %792 }
 0x186   : > { %v840_v29 = vadd.f32 %v2480_v41, %v791_v44  ;;  %v841_v46 = vadd.f32 %v2480_v41, %v793_v33  ;;  %v590_v42 = vpop.xlane.xlu0 %589 }
 0x187   : > { %v630_v31 = vadd.f32 %v2478_v61, %v590_v42 }
 0x188   : > { %v872_v45 = vsub.f32 %v840_v29, %v856_v3  ;;  %v873_v43 = vsub.f32 %v841_v46, %v857_v14 }
 0x189   : > { %v662_v49 = vsub.f32 %v630_v31, %v646_v17 }
 0x18a   : > { %888 = vst [vmem:[#allocation3 + $0x40] sm:$0xff] %v872_v45 }
 0x18b   : > { %889 = vst [vmem:[#allocation3 + $0x48] sm:$0xff] %v873_v43 }
 0x18c   : > { %678 = vst [vmem:[#allocation2 + $0x60] sm:$0xff] %v662_v49 }
 0x18d   : > { %v809_v18 = vpop.xlane.xlu1 %808  ;;  %v576_v51 = vpop.xlane.xlu2 %575 }
 0x18e   : > { %v849_v56 = vadd.f32 %v2480_v41, %v809_v18  ;;  %v623_v25 = vadd.f32 %v2478_v61, %v576_v51  ;;  %v795_v54 = vpop.xlane.xlu0 %794 }
 0x18f   : > { %v842_v48 = vadd.f32 %v2480_v41, %v795_v54 }
 0x190   : > { %v881_v55 = vsub.f32 %v849_v56, %v865_v15  ;;  %v655_v62 = vsub.f32 %v623_v25, %v639_v6 }
 0x191   : > { %v874_v57 = vsub.f32 %v842_v48, %v858_v22 }
 0x192   : > { %897 = vst [vmem:[#allocation3] sm:$0xff] %v881_v55 }
 0x193   : > { %671 = vst [vmem:[#allocation2 + $0x68] sm:$0xff] %v655_v62 }
 0x194   : > { %890 = vst [vmem:[#allocation3 + $0x30] sm:$0xff] %v874_v57 }
 0x195   : > { %v592_v63 = vpop.xlane.xlu1 %591  ;;  %v594_v5 = vpop.xlane.xlu2 %593 }
 0x196   : > { %v631_v34 = vadd.f32 %v2478_v61, %v592_v63  ;;  %v632_v58 = vadd.f32 %v2478_v61, %v594_v5  ;;  %v578_v2 = vpop.xlane.xlu0 %577 }
 0x197   : > { %v624_v47 = vadd.f32 %v2478_v61, %v578_v2 }
 0x198   : > { %v663_v50 = vsub.f32 %v631_v34, %v647_v23  ;;  %v664_v7 = vsub.f32 %v632_v58, %v648_v8 }
 0x199   : > { %v656_v53 = vsub.f32 %v624_v47, %v640_v26 }
 0x19a   : > { %679 = vst [vmem:[#allocation2 + $0x70] sm:$0xff] %v663_v50 }
 0x19b   : > { %680 = vst [vmem:[#allocation2 + $0x78] sm:$0xff] %v664_v7 }
 0x19c   : > { %672 = vst [vmem:[#allocation2 + $0x8] sm:$0xff] %v656_v53 }
 0x19d   : > { %v797_v35 = vpop.xlane.xlu1 %796  ;;  %v799_v10 = vpop.xlane.xlu2 %798 }
 0x19e   : > { %v843_v4 = vadd.f32 %v2480_v41, %v797_v35  ;;  %v844_v11 = vadd.f32 %v2480_v41, %v799_v10  ;;  %v596_v13 = vpop.xlane.xlu0 %595 }
 0x19f   : > { %v633_v38 = vadd.f32 %v2478_v61, %v596_v13 }
 0x1a0   : > { %v875_v1 = vsub.f32 %v843_v4, %v859_v40  ;;  %v876_v9 = vsub.f32 %v844_v11, %v860_v36 }
 0x1a1   : > { %v665_v32 = vsub.f32 %v633_v38, %v649_v37 }
 0x1a2   : > { %891 = vst [vmem:[#allocation3 + $0x70] sm:$0xff] %v875_v1 }
 0x1a3   : > { %892 = vst [vmem:[#allocation3 + $0x38] sm:$0xff] %v876_v9 }
 0x1a4   : > { %681 = vst [vmem:[#allocation2 + $0x28] sm:$0xff] %v665_v32 }
 0x1a5   : > { %v811_v19 = vpop.xlane.xlu2 %810  ;;  %v580_v39 = vpop.xlane.xlu1 %579 }
 0x1a6   : > { %v850_v60 = vadd.f32 %v2480_v41, %v811_v19  ;;  %v625_v20 = vadd.f32 %v2478_v61, %v580_v39  ;;  %v813_v27 = vpop.xlane.xlu0 %812 }
 0x1a7   : > { %v851_v30 = vadd.f32 %v2480_v41, %v813_v27 }
 0x1a8   : > { %v882_v21 = vsub.f32 %v850_v60, %v866_v28  ;;  %v657_v44 = vsub.f32 %v625_v20, %v641_v52 }
 0x1a9   : > { %v883_v33 = vsub.f32 %v851_v30, %v867_v12 }
 0x1aa   : > { %898 = vst [vmem:[#allocation3 + $0x8] sm:$0xff] %v882_v21 }
 0x1ab   : > { %673 = vst [vmem:[#allocation2 + $0x48] sm:$0xff] %v657_v44 }
 0x1ac   : > { %899 = vst [vmem:[#allocation3 + $0x60] sm:$0xff] %v883_v33 }
 0x1ad   : > { %v815_v3 = vpop.xlane.xlu1 %814 }
 0x1ae   : > { %v852_v0 = vadd.f32 %v2480_v41, %v815_v3 }
 0x1b0   : > { %v884_v14 = vsub.f32 %v852_v0, %v868_v24 }
 0x1b2   : > { %900 = vst [vmem:[#allocation3 + $0x50] sm:$0xff] %v884_v14 }
 0x1b3 PF: > { %v914_v61 = vld [vmem:[%s2072_s15 + $0x18] sm:$0xff]  ;;  %v913_v59 = vld [vmem:[%s2072_s15 + $0x10] sm:$0xff]  ;;  %v1934_v29 = vmov 0   ;;  %v1010_v46 = vld [vmem:[#allocation2 + $0x28] sm:$0xff]  ;;  %v909_v38 = vlaneseq  ;;  %v1935_v19 = vmov 1.0   ;;  %v1936_v30 = vmov 0.0  }
 0x1b4   : > { %1771 = vset.pattern.permute.xlu1 %v1934_v29  ;;  %1770 = vset.pattern.permute.xlu0 %v1934_v29  ;;  %v1009_v41 = vld [vmem:[#allocation2 + $0x78] sm:$0xff]  ;;  %v1134_v42 = vld [vmem:[#allocation3 + $0x60] sm:$0xff]  ;;  %v1008_v17 = vld [vmem:[#allocation2 + $0x70] sm:$0xff]  ;;  %vm1115_vm14 = vcmask 7168   ;;  %p1609_p0 = scmp.ne.s32.totalorder %s1915_s10, 1 }
 0x1b5   : > { %925 = vperm.xlu1 %1771, %v914_v61   ;;  %922 = vperm.xlu0 %1770, %v913_v59   ;;  %v1133_v31 = vld [vmem:[#allocation3 + $0x8] sm:$0xff]  ;;  %v1007_v45 = vld [vmem:[#allocation2 + $0x60] sm:$0xff]  ;;  %v1006_v51 = vld [vmem:[#allocation2 + $0x38] sm:$0xff]  ;;  %v2562_v9 = vand.u32 127, %v909_v38 }
 0x1b6   : > { %1650 = vmatpush.msra.mxu2 %v1010_v46  ;;  %1011 = vmatpush.msra.mxu0 %v1010_v46  ;;  %v912_v43 = vld [vmem:[%s2072_s15 + $0x8] sm:$0xff]  ;;  %v911_v49 = vld [vmem:[%s2072_s15] sm:$0xff]  ;;  %v1131_v6 = vld [vmem:[#allocation3 + $0x58] sm:$0xff]  ;;  %s1077_s15 = sld [smem:[#allocation8]] }
 0x1b7   : > { %v1132_v18 = vld [vmem:[#allocation3] sm:$0xff]  ;;  %v1005_v15 = vld [vmem:[#allocation2 + $0x10] sm:$0xff]  ;;  %v1130_v56 = vld [vmem:[#allocation3 + $0x18] sm:$0xff]  ;;  %1772 = vset.pattern.permute.xlu2 %v1934_v29 }
 0x1b8   : > { %1651 = vmatpush.msra.mxu2 %v1009_v41  ;;  %1012 = vmatpush.msra.mxu0 %v1009_v41  ;;  %v1004_v25 = vld [vmem:[#allocation2 + $0x20] sm:$0xff]  ;;  %v1129_v54 = vld [vmem:[#allocation3 + $0x78] sm:$0xff]  ;;  %v941_v55 = vld [vmem:[%s2077_s23 + $0x10] sm:$0xff] }
 0x1b9   : > { %v1135_v16 = vld [vmem:[#allocation3 + $0x50] sm:$0xff]  ;;  %v1003_v22 = vld [vmem:[#allocation2 + $0x40] sm:$0xff]  ;;  %v942_v48 = vld [vmem:[%s2077_s23 + $0x18] sm:$0xff] }
 0x1ba   : > { %1666 = vmatpush.msra.mxu3 %v1135_v16  ;;  %1136 = vmatpush.msra.mxu1 %v1135_v16  ;;  %v1128_v62 = vld [vmem:[#allocation3 + $0x20] sm:$0xff]  ;;  %v1002_v57 = vld [vmem:[#allocation2 + $0x48] sm:$0xff]  ;;  %v1127_v63 = vld [vmem:[#allocation3 + $0x38] sm:$0xff] }
 0x1bb   : > { %1652 = vmatpush.msra.mxu2 %v1008_v17  ;;  %1013 = vmatpush.msra.mxu0 %v1008_v17  ;;  %v1001_v5 = vld [vmem:[#allocation2 + $0x8] sm:$0xff]  ;;  %v1126_v23 = vld [vmem:[#allocation3 + $0x70] sm:$0xff]  ;;  %v998_v50 = vld [vmem:[#allocation2 + $0x18] sm:$0xff] }
 0x1bc   : > { %1667 = vmatpush.msra.mxu3 %v1134_v42  ;;  %1137 = vmatpush.msra.mxu1 %v1134_v42  ;;  %v1000_v8 = vld [vmem:[#allocation2 + $0x68] sm:$0xff]  ;;  %v1125_v34 = vld [vmem:[#allocation3 + $0x30] sm:$0xff]  ;;  %v1123_v7 = vld [vmem:[#allocation3 + $0x40] sm:$0xff] }
 0x1bd   : > { %1653 = vmatpush.msra.mxu2 %v1007_v45  ;;  %1014 = vmatpush.msra.mxu0 %v1007_v45  ;;  %v999_v58 = vld [vmem:[#allocation2 + $0x50] sm:$0xff]  ;;  %v968_v26 = vld [vmem:[%s2082_s24 + $0x8] sm:$0xff]  ;;  %v997_v53 = vld [vmem:[#allocation2 + $0x58] sm:$0xff] }
 0x1be   : > { %1668 = vmatpush.msra.mxu3 %v1133_v31  ;;  %1138 = vmatpush.msra.mxu1 %v1133_v31  ;;  %v969_v2 = vld [vmem:[%s2082_s24 + $0x10] sm:$0xff]  ;;  %v1124_v47 = vld [vmem:[#allocation3 + $0x48] sm:$0xff]  ;;  %v996_v10 = vld [vmem:[#allocation2] sm:$0xff] }
 0x1bf   : > { %919 = vperm.xlu1 %1771, %v912_v43   ;;  %916 = vperm.xlu0 %1770, %v911_v49   ;;  %v1122_v35 = vld [vmem:[#allocation3 + $0x10] sm:$0xff]  ;;  %v1121_v40 = vld [vmem:[#allocation3 + $0x68] sm:$0xff]  ;;  %v939_v11 = vld [vmem:[%s2077_s23] sm:$0xff] }
 0x1c0   : > { %1669 = vmatpush.msra.mxu3 %v1132_v18  ;;  %1654 = vmatpush.msra.mxu2 %v1006_v51  ;;  %v995_v36 = vld [vmem:[#allocation2 + $0x30] sm:$0xff]  ;;  %v1120_v4 = vld [vmem:[#allocation3 + $0x28] sm:$0xff]  ;;  %v967_v37 = vld [vmem:[%s2082_s24] sm:$0xff] }
 0x1c1   : > { %1139 = vmatpush.msra.mxu1 %v1132_v18  ;;  %1015 = vmatpush.msra.mxu0 %v1006_v51  ;;  %v940_v13 = vld [vmem:[%s2077_s23 + $0x8] sm:$0xff]  ;;  %v970_v1 = vld [vmem:[%s2082_s24 + $0x18] sm:$0xff]  ;;  %s1600_s23 = sshll.u32 %s2066_s26, 5  ;;  %s1241_s26 = sld [smem:[#allocation8]] (!%p1609_p0) }
 0x1c2   : > { %1670 = vmatpush.msra.mxu3 %v1131_v6  ;;  %1655 = vmatpush.msra.mxu2 %v1005_v15 }
 0x1c3   : > { %1140 = vmatpush.msra.mxu1 %v1131_v6  ;;  %1016 = vmatpush.msra.mxu0 %v1005_v15 }
 0x1c4   : > { %1671 = vmatpush.msra.mxu3 %v1130_v56  ;;  %1656 = vmatpush.msra.mxu2 %v1004_v25 }
 0x1c5   : > { %1141 = vmatpush.msra.mxu1 %v1130_v56  ;;  %1017 = vmatpush.msra.mxu0 %v1004_v25 }
 0x1c6   : > { %1672 = vmatpush.msra.mxu3 %v1129_v54  ;;  %1657 = vmatpush.msra.mxu2 %v1003_v22 }
 0x1c7   : > { %953 = vperm.xlu1 %1771, %v942_v48   ;;  %950 = vperm.xlu0 %1770, %v941_v55   ;;  %s1242_s24 = scvt.s32.f32 (!%p1609_p0), %s1241_s26 }
 0x1c8   : > { %1673 = vmatpush.msra.mxu3 %v1128_v62  ;;  %1658 = vmatpush.msra.mxu2 %v1002_v57 }
 0x1c9   : > { %1142 = vmatpush.msra.mxu1 %v1129_v54  ;;  %1018 = vmatpush.msra.mxu0 %v1003_v22 }
 0x1ca   : > { %1674 = vmatpush.msra.mxu3 %v1127_v63  ;;  %1659 = vmatpush.msra.mxu2 %v1001_v5 }
 0x1cb   : > { %1143 = vmatpush.msra.mxu1 %v1128_v62  ;;  %1019 = vmatpush.msra.mxu0 %v1002_v57 }
 0x1cc   : > { %1675 = vmatpush.msra.mxu3 %v1126_v23  ;;  %1660 = vmatpush.msra.mxu2 %v1000_v8 }
 0x1cd   : > { %1144 = vmatpush.msra.mxu1 %v1127_v63  ;;  %1020 = vmatpush.msra.mxu0 %v1001_v5 }
 0x1ce   : > { %1676 = vmatpush.msra.mxu3 %v1125_v34  ;;  %1661 = vmatpush.msra.mxu2 %v999_v58 }
 0x1cf   : > { %978 = vperm.xlu1 %1771, %v969_v2   ;;  %975 = vperm.xlu0 %1770, %v968_v26   ;;  %v2586_v2 = vstv %s1600_s23 }
 0x1d0   : > { %1677 = vmatpush.msra.mxu3 %v1124_v47  ;;  %1662 = vmatpush.msra.mxu2 %v998_v50 }
 0x1d1   : > { %1145 = vmatpush.msra.mxu1 %v1126_v23  ;;  %1021 = vmatpush.msra.mxu0 %v1000_v8 }
 0x1d2   : > { %1678 = vmatpush.msra.mxu3 %v1123_v7  ;;  %1663 = vmatpush.msra.mxu2 %v997_v53 }
 0x1d3   : > { %1146 = vmatpush.msra.mxu1 %v1125_v34  ;;  %1022 = vmatpush.msra.mxu0 %v999_v58  ;;  %v1068_v58 = vshrl.u32 %v909_v38, 7 }
 0x1d4   : > { %1679 = vmatpush.msra.mxu3 %v1122_v35  ;;  %1664 = vmatpush.msra.mxu2 %v996_v10 }
 0x1d5   : > { %1147 = vmatpush.msra.mxu1 %v1124_v47  ;;  %1023 = vmatpush.msra.mxu0 %v998_v50  ;;  %v1073_v26 = vadd.s32 %v2586_v2, %v1068_v58  ;;  %v2589_v47 = vstv %s1077_s15 }
 0x1d6   : > { %1680 = vmatpush.msra.mxu3 %v1121_v40  ;;  %1665 = vmatpush.msra.mxu2 %v995_v36 }
 0x1d7   : > { %1148 = vmatpush.msra.mxu1 %v1123_v7  ;;  %1024 = vmatpush.msra.mxu0 %v997_v53  ;;  %vm1079_vm13 = vcmp.lt.s32.totalorder %v1073_v26, %v2589_v47 }
 0x1d8   : > { %1681 = vmatpush.msra.mxu3 %v1120_v4  ;;  %944 = vperm.xlu2 %1772, %v939_v11   ;;  %v1070_v11 = vadd.s32 16, %v1068_v58 }
 0x1d9   : > { %1149 = vmatpush.msra.mxu1 %v1122_v35  ;;  %1025 = vmatpush.msra.mxu0 %v996_v10  ;;  %v1601_v10 = vsel %vm1079_vm13, 1.0, %v1936_v30 }
 0x1db   : > { %1150 = vmatpush.msra.mxu1 %v1121_v40  ;;  %1026 = vmatpush.msra.mxu0 %v995_v36  ;;  %v1189_v36 = vld [vmem:[#allocation5] sm:$0xff] }
 0x1dd   : > { %1151 = vmatpush.msra.mxu1 %v1120_v4 }
 0x1e0   : > { %947 = vperm.xlu2 %1772, %v940_v13  }
 0x1e8   : > { %972 = vperm.xlu2 %1772, %v967_v37  }
 0x1f0   : > { %981 = vperm.xlu2 %1772, %v970_v1  }
 0x227   : > { %v923_v32 = vpop.permute.xlu0 %922  ;;  %v926_v39 = vpop.permute.xlu1 %925 }
 0x228   : > { %vm929_vm1 = vcmp.eq.s32.totalorder %v923_v32, %v2562_v9  ;;  %vm930_vm2 = vcmp.eq.s32.totalorder %v926_v39, %v2562_v9 }
 0x229   : > { %1597 = vmatmul.msk.f32.vlgmr.msra.gmra.mxu2 %vm929_vm1, %v1935_v19  ;;  %1607 = vmatmul.msk.f32.vlgmr.msra.gmra.mxu3 %vm929_vm1, %v1935_v19 }
 0x231   : > { %v917_v52 = vpop.permute.xlu0 %916  ;;  %1598 = vmatmul.msk.f32.gmra.mxu2 %vm930_vm2, %v1935_v19  ;;  %1608 = vmatmul.msk.f32.gmra.mxu3 %vm930_vm2, %v1935_v19  ;;  %v920_v28 = vpop.permute.xlu1 %919 }
 0x232   : > { %vm927_vm3 = vcmp.eq.s32.totalorder %v917_v52, %v2562_v9  ;;  %vm928_vm4 = vcmp.eq.s32.totalorder %v920_v28, %v2562_v9  ;;  %v945_v60 = vpop.permute.xlu2 %944  ;;  %v1075_v28 = vadd.s32 %v2586_v2, %v1070_v11  ;;  %v1214_v11 = vld [vmem:[#allocation6 + $0x8] sm:$0xff] }
 0x233   : > { %1595 = vmatmul.msk.f32.vlgmr.msra.gmra.mxu0 %vm927_vm3, %v1935_v19  ;;  %1605 = vmatmul.msk.f32.vlgmr.msra.gmra.mxu1 %vm927_vm3, %v1935_v19  ;;  %vm955_vm5 = vcmp.eq.s32.totalorder %v945_v60, %v2562_v9  ;;  %v1213_v60 = vld [vmem:[#allocation6] sm:$0xff] }
 0x234   : > { %v1587_v21 = vsel %vm955_vm5, 1.0, %v1936_v30  ;;  %vm1081_vm15 = vcmp.lt.s32.totalorder %v1075_v28, %v2589_v47 }
 0x239   : > { %v954_v12 = vpop.permute.xlu1 %953  ;;  %v951_v33 = vpop.permute.xlu0 %950 }
 0x23a   : > { %v948_v20 = vpop.permute.xlu2 %947  ;;  %vm957_vm8 = vcmp.eq.s32.totalorder %v951_v33, %v2562_v9  ;;  %vm958_vm12 = vcmp.eq.s32.totalorder %v954_v12, %v2562_v9  ;;  %v1091_v12 = vld [vmem:[#allocation4] sm:$0xff] }
 0x23b   : > { %1596 = vmatmul.msk.f32.gmra.mxu0 %vm928_vm4, %v1935_v19  ;;  %1606 = vmatmul.msk.f32.gmra.mxu1 %vm928_vm4, %v1935_v19  ;;  %vm956_vm7 = vcmp.eq.s32.totalorder %v948_v20, %v2562_v9  ;;  %v1589_v16 = vsel %vm957_vm8, 1.0, %v1936_v30  ;;  %v1590_v55 = vsel %vm958_vm12, 1.0, %v1936_v30  ;;  %v1069_v19 = vadd.s32 8, %v1068_v58 }
 0x23c   : > { %v1588_v29 = vsel %vm956_vm7, 1.0, %v1936_v30 }
 0x241   : > { %v979_v31 = vpop.permute.xlu1 %978  ;;  %v976_v45 = vpop.permute.xlu0 %975 }
 0x242   : > { %v973_v27 = vpop.permute.xlu2 %972  ;;  %vm985_vm9 = vcmp.eq.s32.totalorder %v979_v31, %v2562_v9  ;;  %vm984_vm10 = vcmp.eq.s32.totalorder %v976_v45, %v2562_v9 }
 0x243   : > { %vm983_vm6 = vcmp.eq.s32.totalorder %v973_v27, %v2562_v9  ;;  %v1593_v49 = vsel %vm985_vm9, 1.0, %v1936_v30  ;;  %v1592_v18 = vsel %vm984_vm10, 1.0, %v1936_v30 }
 0x244   : > { %v1591_v3 = vsel %vm983_vm6, 1.0, %v1936_v30 }
 0x24a   : > { %v982_v6 = vpop.permute.xlu2 %981 }
 0x24b   : > { %vm986_vm11 = vcmp.eq.s32.totalorder %v982_v6, %v2562_v9  ;;  %v1092_v6 = vld [vmem:[#allocation4 + $0x8] sm:$0xff] }
 0x24c   : > { %v1594_v48 = vsel %vm986_vm11, 1.0, %v1936_v30 }
 0x2ac   : > { %v1034_v59 = vpop.f32.mrf.mxu2  ;;  %v1159_v43 = vpop.f32.mrf.mxu3 }
 0x2ad   : > { %v1042_v17 = vmul.f32 %v1589_v16, %v1034_v59  ;;  %v1167_v51 = vmul.f32 %v1589_v16, %v1159_v43  ;;  %v1054_v56 = vmul.f32 %v1593_v49, %v1034_v59  ;;  %v1179_v8 = vmul.f32 %v1593_v49, %v1159_v43 }
 0x2ae   : > { %v1603_v59 = vsel %vm1081_vm15, 1.0, %v1936_v30 }
 0x2b0   : > { %v1028_v44 = vpop.f32.mrf.mxu0  ;;  %v1153_v24 = vpop.f32.mrf.mxu1 }
 0x2b1   : > { %v1040_v0 = vmul.f32 %v1587_v21, %v1028_v44  ;;  %v1177_v14 = vmul.f32 %v1591_v3, %v1153_v24  ;;  %v1165_v61 = vmul.f32 %v1587_v21, %v1153_v24  ;;  %v1052_v42 = vmul.f32 %v1591_v3, %v1028_v44 }
 0x2b2   : > { %v1074_v21 = vadd.s32 %v2586_v2, %v1069_v19  ;;  %v1094_v19 = vld [vmem:[#allocation4 + $0x18] sm:$0xff] }
 0x2b3   : > { %1044 = vadd.xlane.f32.xlu0 %v1040_v0  ;;  %1181 = vadd.xlane.f32.xlu2 %v1177_v14 }
 0x2b4   : > { %1169 = vadd.xlane.f32.xlu1 %v1165_v61  ;;  %v1037_v25 = vpop.f32.mrf.mxu2  ;;  %v1162_v54 = vpop.f32.mrf.mxu3  ;;  %vm1080_vm0 = vcmp.lt.s32.totalorder %v1074_v21, %v2589_v47  ;;  %v1216_v21 = vld [vmem:[#allocation6 + $0x18] sm:$0xff] }
 0x2b5   : > { %v1055_v62 = vmul.f32 %v1594_v48, %v1037_v25  ;;  %v1168_v57 = vmul.f32 %v1590_v55, %v1162_v54  ;;  %v1043_v23 = vmul.f32 %v1590_v55, %v1037_v25  ;;  %v1180_v34 = vmul.f32 %v1594_v48, %v1162_v54 }
 0x2b6   : > { %v1602_v45 = vsel %vm1080_vm0, 1.0, %v1936_v30  ;;  %v1071_v54 = vadd.s32 24, %v1068_v58 }
 0x2b8   : > { %v1031_v46 = vpop.f32.mrf.mxu0  ;;  %v1156_v22 = vpop.f32.mrf.mxu1 }
 0x2b9   : > { %v1041_v41 = vmul.f32 %v1588_v29, %v1031_v46  ;;  %v1053_v15 = vmul.f32 %v1592_v18, %v1031_v46  ;;  %v1166_v63 = vmul.f32 %v1588_v29, %v1156_v22  ;;  %v1178_v5 = vmul.f32 %v1592_v18, %v1156_v22  ;;  %v1093_v18 = vld [vmem:[#allocation4 + $0x10] sm:$0xff] }
 0x2bb   : > { %1056 = vadd.xlane.f32.xlu0 %v1052_v42  ;;  %1048 = vadd.xlane.f32.xlu2 %v1042_v17  ;;  %v1191_v42 = vld [vmem:[#allocation5 + $0x10] sm:$0xff] }
 0x2bc   : > { %1046 = vadd.xlane.f32.xlu1 %v1041_v41 }
 0x2c3   : > { %1173 = vadd.xlane.f32.xlu0 %v1167_v51  ;;  %1060 = vadd.xlane.f32.xlu2 %v1054_v56 }
 0x2c4   : > { %1058 = vadd.xlane.f32.xlu1 %v1053_v15 }
 0x2cb   : > { %1062 = vadd.xlane.f32.xlu0 %v1055_v62  ;;  %1171 = vadd.xlane.f32.xlu2 %v1166_v63 }
 0x2cc   : > { %1175 = vadd.xlane.f32.xlu1 %v1168_v57 }
 0x2d3   : > { %1183 = vadd.xlane.f32.xlu0 %v1178_v5  ;;  %1050 = vadd.xlane.f32.xlu2 %v1043_v23  ;;  %v1076_v5 = vadd.s32 %v2586_v2, %v1071_v54  ;;  %v1190_v23 = vld [vmem:[#allocation5 + $0x8] sm:$0xff] }
 0x2d4   : > { %1185 = vadd.xlane.f32.xlu1 %v1179_v8 }
 0x2d5   : > { %vm1082_vm1 = vcmp.lt.s32.totalorder %v1076_v5, %v2589_v47 }
 0x2db   : > { %1187 = vadd.xlane.f32.xlu2 %v1180_v34 }
 0x326   : > { %v1045_v50 = vpop.xlane.xlu0 %1044  ;;  %v1182_v7 = vpop.xlane.xlu2 %1181 }
 0x327   : > { %v1170_v53 = vpop.xlane.xlu1 %1169 }
 0x328   : > { %v1193_v35 = vsub.f32 %v1045_v50, %v1170_v53 }
 0x32a   : > { %v1197_v40 = vmax.f32 %v1193_v35, 0.0 }
 0x32c   : > { %v1201_v4 = vmul.f32 %v1601_v10, %v1197_v40  ;;  %v1604_v40 = vsel %vm1082_vm1, 1.0, %v1936_v30 }
 0x32e   : > { %v1205_v13 = vadd.f32 %v1201_v4, %v1189_v36  ;;  %v1057_v37 = vpop.xlane.xlu0 %1056  ;;  %v1049_v38 = vpop.xlane.xlu2 %1048 }
 0x32f   : > { %v1095_v1 = vsub.f32 %v1045_v50, %v1057_v37  ;;  %v1217_v9 = vsub.f32 %v1182_v7, %v1057_v37  ;;  %v1047_v32 = vpop.xlane.xlu1 %1046  ;;  %v1192_v37 = vld [vmem:[#allocation5 + $0x18] sm:$0xff] }
 0x330   : > { %1209 = vst.msk [vmem:[#allocation5] sm:$0xff] %vm1115_vm14, %v1205_v13 }
 0x331   : > { %v1099_v39 = vadd.f32 1.0, %v1095_v1  ;;  %v1221_v52 = vmax.f32 %v1217_v9, 0.0  ;;  %v1215_v1 = vld [vmem:[#allocation6 + $0x10] sm:$0xff] }
 0x333   : > { %v1103_v20 = vmax.f32 %v1099_v39, 0.0  ;;  %v1225_v27 = vmul.f32 %v1601_v10, %v1221_v52 }
 0x335   : > { %v1107_v44 = vmul.f32 %v1601_v10, %v1103_v20  ;;  %v1229_v33 = vadd.f32 %v1225_v27, %v1213_v60 }
 0x336   : > { %v1174_v3 = vpop.xlane.xlu0 %1173  ;;  %v1061_v0 = vpop.xlane.xlu2 %1060 }
 0x337   : > { %v1111_v24 = vadd.f32 %v1107_v44, %v1091_v12  ;;  %1233 = vst.msk [vmem:[#allocation6] sm:$0xff] %vm1115_vm14, %v1229_v33  ;;  %v1195_v14 = vsub.f32 %v1049_v38, %v1174_v3  ;;  %v1059_v61 = vpop.xlane.xlu1 %1058  ;;  %v1097_v29 = vsub.f32 %v1049_v38, %v1061_v0 }
 0x338   : > { %v1096_v46 = vsub.f32 %v1047_v32, %v1059_v61 }
 0x339   : > { %1116 = vst.msk [vmem:[#allocation4] sm:$0xff] %vm1115_vm14, %v1111_v24  ;;  %v1199_v16 = vmax.f32 %v1195_v14, 0.0  ;;  %v1101_v41 = vadd.f32 1.0, %v1097_v29 }
 0x33a   : > { %v1100_v17 = vadd.f32 1.0, %v1096_v46 }
 0x33b   : > { %v1203_v31 = vmul.f32 %v1603_v59, %v1199_v16  ;;  %v1105_v43 = vmax.f32 %v1101_v41, 0.0 }
 0x33c   : > { %v1104_v49 = vmax.f32 %v1100_v17, 0.0 }
 0x33d   : > { %v1207_v51 = vadd.f32 %v1203_v31, %v1191_v42  ;;  %v1109_v15 = vmul.f32 %v1603_v59, %v1105_v43 }
 0x33e   : > { %v1108_v56 = vmul.f32 %v1602_v45, %v1104_v49  ;;  %v1063_v25 = vpop.xlane.xlu0 %1062  ;;  %v1172_v22 = vpop.xlane.xlu2 %1171 }
 0x33f   : > { %1211 = vst.msk [vmem:[#allocation5 + $0x10] sm:$0xff] %vm1115_vm14, %v1207_v51  ;;  %v1176_v48 = vpop.xlane.xlu1 %1175  ;;  %v1113_v55 = vadd.f32 %v1109_v15, %v1093_v18  ;;  %v1194_v57 = vsub.f32 %v1047_v32, %v1172_v22 }
 0x340   : > { %v1112_v62 = vadd.f32 %v1108_v56, %v1092_v6 }
 0x341   : > { %1118 = vst.msk [vmem:[#allocation4 + $0x10] sm:$0xff] %vm1115_vm14, %v1113_v55  ;;  %v1198_v63 = vmax.f32 %v1194_v57, 0.0 }
 0x342   : > { %1117 = vst.msk [vmem:[#allocation4 + $0x8] sm:$0xff] %vm1115_vm14, %v1112_v62 }
 0x343   : > { %v1202_v8 = vmul.f32 %v1602_v45, %v1198_v63 }
 0x345   : > { %v1206_v34 = vadd.f32 %v1202_v8, %v1190_v23 }
 0x346   : > { %v1184_v58 = vpop.xlane.xlu0 %1183  ;;  %v1051_v26 = vpop.xlane.xlu2 %1050 }
 0x347   : > { %v1218_v50 = vsub.f32 %v1184_v58, %v1059_v61  ;;  %v1186_v7 = vpop.xlane.xlu1 %1185  ;;  %1210 = vst.msk [vmem:[#allocation5 + $0x8] sm:$0xff] %vm1115_vm14, %v1206_v34  ;;  %v1098_v53 = vsub.f32 %v1051_v26, %v1063_v25  ;;  %v1196_v35 = vsub.f32 %v1051_v26, %v1176_v48 }
 0x348   : > { %v1219_v10 = vsub.f32 %v1186_v7, %v1061_v0 }
 0x349   : > { %v1222_v36 = vmax.f32 %v1218_v50, 0.0  ;;  %v1102_v2 = vadd.f32 1.0, %v1098_v53  ;;  %v1200_v4 = vmax.f32 %v1196_v35, 0.0 }
 0x34a   : > { %v1223_v13 = vmax.f32 %v1219_v10, 0.0 }
 0x34b   : > { %v1226_v38 = vmul.f32 %v1602_v45, %v1222_v36  ;;  %v1106_v47 = vmax.f32 %v1102_v2, 0.0  ;;  %v1204_v9 = vmul.f32 %v1604_v40, %v1200_v4 }
 0x34c   : > { %v1227_v32 = vmul.f32 %v1603_v59, %v1223_v13 }
 0x34d   : > { %v1230_v39 = vadd.f32 %v1226_v38, %v1214_v11  ;;  %v1110_v52 = vmul.f32 %v1604_v40, %v1106_v47  ;;  %v1208_v28 = vadd.f32 %v1204_v9, %v1192_v37 }
 0x34e   : > { %v1231_v60 = vadd.f32 %v1227_v32, %v1215_v1  ;;  %v1188_v20 = vpop.xlane.xlu2 %1187 }
 0x34f   : > { %1234 = vst.msk [vmem:[#allocation6 + $0x8] sm:$0xff] %vm1115_vm14, %v1230_v39  ;;  %v1114_v30 = vadd.f32 %v1110_v52, %v1094_v19  ;;  %v1220_v27 = vsub.f32 %v1188_v20, %v1063_v25 }
 0x350   : > { %1212 = vst.msk [vmem:[#allocation5 + $0x18] sm:$0xff] %vm1115_vm14, %v1208_v28 }
 0x351   : > { %1235 = vst.msk [vmem:[#allocation6 + $0x10] sm:$0xff] %vm1115_vm14, %v1231_v60  ;;  %v1224_v12 = vmax.f32 %v1220_v27, 0.0 }
 0x352   : > { %1119 = vst.msk [vmem:[#allocation4 + $0x18] sm:$0xff] %vm1115_vm14, %v1114_v30 }
 0x353   : > { %v1228_v44 = vmul.f32 %v1604_v40, %v1224_v12  ;;  %1240 = sbr.rel (%p1609_p0) target bundleno = 1051 (0x41b), region = 48 }
 0x355   : > { %v1232_v33 = vadd.f32 %v1228_v44, %v1216_v21 }
 0x357   : > { %1236 = vst.msk [vmem:[#allocation6 + $0x18] sm:$0xff] %vm1115_vm14, %v1232_v33 }
 0x358   : > { %v1243_v3 = vstv %s1242_s24  ;;  %v1302_v17 = vld [vmem:[#allocation6] sm:$0xff]  ;;  %v1303_v31 = vld [vmem:[#allocation6 + $0x8] sm:$0xff]  ;;  %v1304_v15 = vld [vmem:[#allocation6 + $0x10] sm:$0xff]  ;;  %v1937_v58 = vmov 0  }
 0x359   : > { %1775 = vrcp.f32 %v1243_v3  ;;  %v1255_v14 = vand.u32 2147483648, %v1243_v3  ;;  %vm1249_vm2 = vweird.f32 %v1243_v3  ;;  %v1253_v59 = vand.u32 2147483647, %v1243_v3  ;;  %v1259_v45 = vld [vmem:[#allocation4] sm:$0xff]  ;;  %v1260_v43 = vld [vmem:[#allocation4 + $0x8] sm:$0xff]  ;;  %v1261_v56 = vld [vmem:[#allocation4 + $0x10] sm:$0xff]  ;;  %1774 = vset.pattern.permute.xlu1 %v1937_v58  ;;  %1773 = vset.pattern.permute.xlu0 %v1937_v58 }
 0x35a   : > { %v1306_v49 = vsel %vm1115_vm14, %v1302_v17, 0.0  ;;  %v1307_v18 = vsel %vm1115_vm14, %v1303_v31, 0.0  ;;  %v1263_v51 = vsel %vm1115_vm14, %v1259_v45, 0.0  ;;  %v1264_v6 = vsel %vm1115_vm14, %v1260_v43, 0.0  ;;  %v1284_v22 = vld [vmem:[#allocation5] sm:$0xff]  ;;  %v1285_v62 = vld [vmem:[#allocation5 + $0x8] sm:$0xff] }
 0x35b   : > { %v1256_v46 = vor.u32 1.1754944e-38, %v1255_v14  ;;  %vm1254_vm5 = vcmp.eq.f32.partialorder %v1253_v59, 8.507059e+37  ;;  %v1308_v25 = vadd.f32 %v1307_v18, %v1306_v49  ;;  %v1265_v54 = vadd.f32 %v1264_v6, %v1263_v51  ;;  %v1262_v63 = vld [vmem:[#allocation4 + $0x18] sm:$0xff]  ;;  %v1286_v7 = vld [vmem:[#allocation5 + $0x10] sm:$0xff] }
 0x35c   : > { %v1309_v48 = vsel %vm1115_vm14, %v1304_v15, 0.0  ;;  %v1266_v55 = vsel %vm1115_vm14, %v1261_v56, 0.0  ;;  %v1288_v8 = vsel %vm1115_vm14, %v1284_v22, 0.0  ;;  %v1289_v34 = vsel %vm1115_vm14, %v1285_v62, 0.0  ;;  %v1287_v36 = vld [vmem:[#allocation5 + $0x18] sm:$0xff] }
 0x35d   : > { %v1310_v5 = vadd.f32 %v1309_v48, %v1308_v25  ;;  %v1267_v23 = vadd.f32 %v1266_v55, %v1265_v54  ;;  %v1268_v50 = vsel %vm1115_vm14, %v1262_v63, 0.0  ;;  %v1290_v53 = vadd.f32 %v1289_v34, %v1288_v8 }
 0x35e   : > { %v1305_v57 = vld [vmem:[#allocation6 + $0x18] sm:$0xff]  ;;  %v1291_v40 = vsel %vm1115_vm14, %v1286_v7, 0.0  ;;  %v1293_v13 = vsel %vm1115_vm14, %v1287_v36, 0.0 }
 0x35f   : > { %v1776_v24 = vpop.eup %1775  ;;  %v1311_v26 = vsel %vm1115_vm14, %v1305_v57, 0.0  ;;  %v1269_v10 = vadd.f32 %v1268_v50, %v1267_v23  ;;  %v1292_v2 = vadd.f32 %v1291_v40, %v1290_v53 }
 0x360   : > { %v1245_v0 = vmul.f32 %v1776_v24, %v1243_v3  ;;  %vm1250_vm3 = vweird.f32 %v1776_v24  ;;  %v1312_v35 = vadd.f32 %v1311_v26, %v1310_v5 }
 0x361   : > { %vm1251_vm4 = vmor %vm1249_vm2, %vm1250_vm3  ;;  %v1270_v11 = vrot.slane %v1269_v10, 4  ;;  %v1294_v37 = vadd.f32 %v1293_v13, %v1292_v2 }
 0x362   : > { %v1246_v61 = vsub.f32 1.0, %v1245_v0  ;;  %v1313_v4 = vrot.slane %v1312_v35, 4 }
 0x363   : > { %v1271_v1 = vadd.f32 %v1270_v11, %v1269_v10  ;;  %v1295_v47 = vrot.slane %v1294_v37, 4 }
 0x364   : > { %v1247_v29 = vmul.f32 %v1776_v24, %v1246_v61  ;;  %v1314_v38 = vadd.f32 %v1313_v4, %v1312_v35 }
 0x365   : > { %v1272_v32 = vrot.slane %v1271_v1, 2  ;;  %v1296_v19 = vadd.f32 %v1295_v47, %v1294_v37 }
 0x366   : > { %v1248_v16 = vadd.f32 %v1776_v24, %v1247_v29  ;;  %v1315_v9 = vrot.slane %v1314_v38, 2 }
 0x367   : > { %v1273_v52 = vadd.f32 %v1272_v32, %v1271_v1  ;;  %v1297_v28 = vrot.slane %v1296_v19, 2 }
 0x368   : > { %v1252_v41 = vsel %vm1251_vm4, %v1776_v24, %v1248_v16  ;;  %v1316_v39 = vadd.f32 %v1315_v9, %v1314_v38 }
 0x369   : > { %v1257_v42 = vsel %vm1254_vm5, %v1256_v46, %v1252_v41  ;;  %v1274_v20 = vrot.slane %v1273_v52, 1  ;;  %v1298_v30 = vadd.f32 %v1297_v28, %v1296_v19 }
 0x36a   : > { %1682 = vpush %v1257_v42  ;;  %v1317_v60 = vrot.slane %v1316_v39, 1 }
 0x36b   : > { %v1275_v12 = vadd.f32 %v1274_v20, %v1273_v52  ;;  %v1299_v44 = vrot.slane %v1298_v30, 1 }
 0x36c   : > { %v1318_v27 = vadd.f32 %v1317_v60, %v1316_v39 }
 0x36d   : > { %v1300_v24 = vadd.f32 %v1299_v44, %v1298_v30 }
 0x39b   : > { %s1683_s10 = spop %1682 }
 0x39c   : > { %v1276_v21 = vstv %s1683_s10 }
 0x39d   : > { %v1319_v33 = vmul.f32 %v1318_v27, %v1276_v21  ;;  %v1277_v3 = vmul.f32 %v1276_v21, %v1275_v12  ;;  %v1301_v0 = vmul.f32 %v1300_v24, %v1276_v21 }
 0x39f   : > { %1328 = vperm.xlu1 %1774, %v1319_v33   ;;  %1280 = vperm.xlu0 %1773, %v1277_v3  }
 0x3a7   : > { %1322 = vperm.xlu0 %1773, %v1301_v0  }
 0x411   : > { %v1329_v14 = vpop.permute.xlu1 %1328  ;;  %v1281_v61 = vpop.permute.xlu0 %1280 }
 0x412   : > { %1331 = vst [vmem:[%s366_s9] sm:$0xff] %v1329_v14 }
 0x413   : > { %1283 = vst [vmem:[%s352_s12] sm:$0xff] %v1281_v61 }
 0x419   : > { %v1323_v59 = vpop.permute.xlu0 %1322 }
 0x41a   : > { %1325 = vst [vmem:[%s359_s22] sm:$0xff] %v1323_v59 }
 0x41b PF: > { %s2749_s27 = sadd.s32 4294967295, %s1931_s14   ;;  %s2638_s21 = sshll.u32 %s1919_s11, 3 }
 0x41c   : > { %s2635_s20 = sand.u32 1, %s2749_s27   ;;  %s1367_s16 = scalar_lea.hbm %s2732_s7, %s2638_s21 }
 0x41d   : > { %s1369_s17 = sshll.u32 %s359_s22, 4  ;;  %s1371_s28 = sshll.u32 %s1367_s16, 4  ;;  %s1370_s17 = int_to_ptr.vmem [resolvable:$true] %s1369_s17  ;;  %s1372_s28 = int_to_ptr.hbm [resolvable:$true] %s1371_s28 }
 0x41e   : > { %s1338_s15 = scalar_lea.sflag [#allocation12], %s2635_s20  ;;  %s1791_s23 = sshra.s32 %s1372_s28, 4  ;;  %s1792_s23 = int_to_ptr.hbm [resolvable:$true] %s1791_s23 }
 0x41f   : > { %s1793_s26 = scalar_lea.hbm %s1792_s23, 8  ;;  %s1797_s10 = scalar_lea.hbm %s2732_s7, 16 }
 0x420   : > { %p1794_p1 = scmp.ne.s32.totalorder %s1792_s23, %s1793_s26  ;;  %p1798_p5 = scmp.lt.s32.totalorder %s1792_s23, %s2732_s7 }
 0x421   : > { %p1799_p6 = scmp.lt.s32.totalorder %s1797_s10, %s1793_s26 }
 0x422   : > { %p1795_p2 = pnand %p1794_p1, %p2037_p3 }
 0x423   : > { %p1800_p7 = por %p1799_p6, %p1798_p5 }
 0x424   : > { %p1796_p4 = pneg %p1795_p2 }
 0x426   : > { %p1801_p8 = pnand %p1800_p7, %p1796_p4 }
 0x428   : > { %1804 = shalt.err (!%p1801_p8)
}
 0x429   : > { %1685 = dma.vmem_to_hbm [thread:$0]  (%p2037_p3), %s1370_s17, 128, %s1372_s28, %s1338_s15  }
 0x42a   : > { %s1353_s16 = scalar_lea.hbm %s2731_s6, %s2638_s21  ;;  %s1355_s11 = sshll.u32 %s352_s12, 4  ;;  %s1356_s11 = int_to_ptr.vmem [resolvable:$true] %s1355_s11 }
 0x42b   : > { %s1357_s23 = sshll.u32 %s1353_s16, 4  ;;  %s2750_s26 = sand.u32 1, %s1907_s30   ;;  %s1358_s23 = int_to_ptr.hbm [resolvable:$true] %s1357_s23 }
 0x42c   : > { %s1333_s24 = scalar_lea.sflag [#allocation10], %s2750_s26  ;;  %s1819_s10 = sshra.s32 %s1358_s23, 4  ;;  %s1820_s10 = int_to_ptr.hbm [resolvable:$true] %s1819_s10 }
 0x42d   : > { %s1821_s27 = scalar_lea.hbm %s1820_s10, 8  ;;  %s1825_s28 = scalar_lea.hbm %s2731_s6, 16 }
 0x42e   : > { %p1822_p10 = scmp.ne.s32.totalorder %s1820_s10, %s1821_s27  ;;  %p1826_p13 = scmp.lt.s32.totalorder %s1820_s10, %s2731_s6 }
 0x42f   : > { %p1827_p0 = scmp.lt.s32.totalorder %s1825_s28, %s1821_s27 }
 0x430   : > { %p1823_p11 = pnand %p1822_p10, %p2037_p3 }
 0x431   : > { %p1828_p1 = por %p1827_p0, %p1826_p13 }
 0x432   : > { %p1824_p12 = pneg %p1823_p11 }
 0x434   : > { %p1829_p2 = pnand %p1828_p1, %p1824_p12 }
 0x436   : > { %1832 = shalt.err (!%p1829_p2)
}
 0x437   : > { %1684 = dma.vmem_to_hbm [thread:$0]  (%p2037_p3), %s1356_s11, 128, %s1358_s23, %s1333_s24  }
 0x438   : > { %s1381_s26 = scalar_lea.hbm %s2733_s8, %s2638_s21  ;;  %s1383_s0 = sshll.u32 %s366_s9, 4  ;;  %s1384_s0 = int_to_ptr.vmem [resolvable:$true] %s1383_s0 }
 0x439   : > { %s1385_s17 = sshll.u32 %s1381_s26, 4  ;;  %s1853_s11 = scalar_lea.hbm %s2733_s8, 16  ;;  %s1386_s17 = int_to_ptr.hbm [resolvable:$true] %s1385_s17 }
 0x43a   : > { %s1847_s10 = sshra.s32 %s1386_s17, 4  ;;  %s1848_s10 = int_to_ptr.hbm [resolvable:$true] %s1847_s10 }
 0x43b   : > { %s1849_s27 = scalar_lea.hbm %s1848_s10, 8  ;;  %p1854_p7 = scmp.lt.s32.totalorder %s1848_s10, %s2733_s8 }
 0x43c   : > { %p1850_p4 = scmp.ne.s32.totalorder %s1848_s10, %s1849_s27  ;;  %p1855_p8 = scmp.lt.s32.totalorder %s1853_s11, %s1849_s27 }
 0x43e   : > { %p1851_p5 = pnand %p1850_p4, %p2037_p3  ;;  %p1856_p10 = por %p1855_p8, %p1854_p7 }
 0x440   : > { %p1852_p6 = pneg %p1851_p5 }
 0x442   : > { %p1857_p11 = pnand %p1856_p10, %p1852_p6 }
 0x444   : > { %1860 = shalt.err (!%p1857_p11)
}
 0x445   : > { %1686 = dma.vmem_to_hbm [thread:$0]  (%p2037_p3), %s1384_s0, 128, %s1386_s17, %s1338_s15  }
 0x446 PF: > { %p1700_p12 = scmp.ge.s32.totalorder %s1931_s14, 2  ;;  %s1397_s9 = sand.u32 1, %s1903_s29  }
 0x447   : > { %s1398_s25 = scalar_lea.sflag [#allocation10], %s1397_s9 }
 0x448   : > { %p1691_p13 = pnand %p1700_p12, %p2049_p9 }
 0x44a   : > { %p1692_p0 = pneg %p1691_p13 }
 0x44c   : > { %1894 = dma.done.wait (%p1692_p0), %s1398_s25, 128  }
 0x44d   : > { %1896 = vsyncadd (%p1692_p0), %s1398_s25, 4294967168  ;;  %s2751_s21 = sadd.s32 4294967294, %s1931_s14  }
 0x44e   : > { %s1407_s13 = sand.u32 1, %s2751_s21  }
 0x44f   : > { %s1408_s12 = scalar_lea.sflag [#allocation12], %s1407_s13 }
 0x450   : > { %1898 = dma.done.wait (%p1692_p0), %s1408_s12, 256  }
 0x451   : > { %1900 = vsyncadd (%p1692_p0), %s1408_s12, 4294967040  ;;  %s26_s14 = sadd.s32 1, %s1931_s14   ;;  %s2752_s18 = sld [smem:[#allocation16_spill]] }
 0x452   : > { %p23_p3 = scmp.ge.s32.totalorder %s26_s14, 6   ;;  %s2753_s9 = sld [smem:[#allocation21_spill]] }
 0x453   : > { %s2754_s10 = sld [smem:[#allocation17_spill]]  ;;  %s2758_s29 = smov %s1907_s30 }
 0x454   : > { %s2755_s11 = sld [smem:[#allocation18_spill]]  ;;  %25 = sbr.rel (!%p23_p3) target bundleno = 9 (0x9), region = 121 }
 0x455   : > { %s2756_s12 = sld [smem:[#allocation19_spill]] }
 0x456   : > { %s2757_s13 = sld [smem:[#allocation20_spill]] }
 0x457   : > { %s2759_s30 = smov %s2752_s18 }
 0x459   :  { %1424 = vsyncpa [#allocation10], 1 }
 0x45a   :  { %1426 = vsyncpa [#allocation10 + $0x1], 1 }
 0x45b   :  { %1427 = vsyncpa [#allocation12], 1 }
 0x45c   :  { %1429 = vsyncpa [#allocation12 + $0x1], 1 }

</bundles_post_ra>
